<compile_context>
chip_gen: v7x
topology: tpu7x:2x2x1
jax: 0.10.0
libtpu: 0.0.40
codegen_flags: <defaults>
</compile_context>

<pallas_src>
import jax
import jax.numpy as jnp
from jax import lax
from jax.experimental import pallas as pl
from jax.experimental.pallas import tpu as pltpu

_LN_EPS = 1e-5  # torch.nn.LayerNorm default eps


def _round_up(x, m):
    return ((x + m - 1) // m) * m


def _layer_norm(x, w=None, b=None, eps=_LN_EPS):
    # One-pass LN: var = E[x^2] - mean^2 (fewer VALU passes than centered var).
    mean = jnp.mean(x, axis=-1, keepdims=True)
    msq = jnp.mean(x * x, axis=-1, keepdims=True)
    var = jnp.maximum(msq - mean * mean, 0.0)
    xhat = (x - mean) * lax.rsqrt(var + eps)
    if w is not None:
        xhat = xhat * w + b
    return xhat


def _gelu_exact(x):
    # Matches torch.nn.functional.gelu default (erf-based, approximate='none').
    return 0.5 * x * (1.0 + lax.erf(x * 0.7071067811865476))


def _make_mlp_kernel(depth, input_norm):
    """Builds the fused MLP kernel (depth is a static Python int -> unrolled)."""

    def kernel(*refs):
        idx = 0
        x = refs[idx][...]  # (TN, H) f32 activations for this row tile
        idx += 1
        if input_norm:
            ln_w = refs[idx][...]; idx += 1
            ln_b = refs[idx][...]; idx += 1
            x = _layer_norm(x, ln_w, ln_b)
        for i in range(depth):
            w = refs[idx][...]; idx += 1        # (H, H) bf16 (pre-cast in wrapper)
            b = refs[idx][...]; idx += 1        # (1, H) f32
            # bf16 MXU operands, f32 accumulation.
            y = jnp.dot(x.astype(jnp.bfloat16), w,
                        preferred_element_type=jnp.float32) + b
            y = _gelu_exact(y)
            # TODO(synk): the PyTorch forward does `y = nn.LayerNorm(y)` which
            # constructs a Module (a bug, would crash at `x + y`); we implement
            # the clearly-intended op: a parameter-free layer norm over features.
            y = _layer_norm(y)
            x = x + y if i > 0 else y
        w_out = refs[idx][...]; idx += 1        # (H, OUT_PAD) bf16
        b_out = refs[idx][...]; idx += 1        # (1, OUT_PAD) f32
        o_ref = refs[idx]
        o_ref[...] = (jnp.dot(x.astype(jnp.bfloat16), w_out,
                              preferred_element_type=jnp.float32)
                      + b_out).astype(o_ref.dtype)

    return kernel


# ----------------------------- hardware profile -----------------------------

def _hw_profile():
    """(vmem_capacity_bytes, mxu_row_align, want_megacore_split)."""
    vmem_cap = 64 * 1024 * 1024  # conservative default (v7x per-TC VMEM)
    try:
        info = pltpu.get_tpu_info()
        cap = getattr(info, "vmem_capacity_bytes", None)
        if cap:
            vmem_cap = int(cap)
    except Exception:
        pass
    kind = ""
    try:
        kind = jax.devices()[0].device_kind.lower()
    except Exception:
        pass
    is_v5e = ("v5 lite" in kind) or ("v5e" in kind) or ("v5litepod" in kind)
    is_v7 = "v7" in kind
    mxu_align = 128 if is_v5e else 256   # v5e MXU is 4x128^2; v6e/v7x are 2x256^2
    want_split = is_v7                   # megacore sharding only pays with 2 TCs
    return vmem_cap, mxu_align, want_split


def _plan(N, H, out_dim, depth, input_norm, row_tile, single_buffer_weights):
    """Pick out_pad, row tile, padded N, and a VMEM limit from real buffer sizes."""
    vmem_cap, align, want_split = _hw_profile()

    # Lane-dense output slab. Don't inflate tiny outputs past 128 lanes.
    lane_align = align if out_dim > 128 else 128
    out_pad = _round_up(max(out_dim, 128), lane_align)

    # Resident parameter bytes (bf16 weights, f32 biases/LN params).
    wmul = 1 if single_buffer_weights else 2   # default pipelining double-buffers
    w_bytes = (depth * H * H * 2 + H * out_pad * 2) * wmul
    p_bytes = (depth * H * 4 + out_pad * 4 + (2 * H * 4 if input_norm else 0)) * wmul
    resident = w_bytes + p_bytes

    # Per-row pipelined activation bytes: 2x input tile + 2x output tile (f32).
    per_row = 2 * H * 4 + 2 * out_pad * 4

    # Leave headroom for compiler-internal scratch; cap ~100 MiB on 128-MiB chips.
    budget = max(min(vmem_cap - (16 << 20), 100 << 20), 24 << 20)
    act_budget = budget - resident
    # TODO(synk): if resident weights alone exceed the budget (large H/depth on
    # v7x's 64 MiB VMEM), stream each weight as (H, 512) column panels with
    # pltpu.emit_pipeline instead of keeping it resident; not needed at these sizes.

    tn_cap_rows = _round_up(N, 8)                       # never tile wider than the data
    if want_split and N > 8:
        tn_cap_rows = min(tn_cap_rows, _round_up((N + 1) // 2, 8))  # >=2 tiles for 2 TCs
    tn_cap_vmem = max(8, (max(act_budget, 0) // max(per_row, 1)) // 8 * 8)

    tn = max(8, min(row_tile, tn_cap_rows, tn_cap_vmem))
    if tn >= align:
        tn = (tn // align) * align                      # MXU-friendly row panel
    n_pad = _round_up(N, tn)

    needed = resident + tn * per_row
    vmem_limit = int(min(max(needed + (8 << 20), 32 << 20),
                         max(vmem_cap - (8 << 20), 32 << 20)))
    return out_pad, tn, n_pad, vmem_limit


# --------------------------------- wrapper -----------------------------------

def mlp_forward(x2d, params, depth, input_norm, *, row_tile=512):
    """x2d: (N, H) float32.  Returns (N, output_dim) float32."""
    N, H = x2d.shape
    out_dim = params["w_out"].shape[1]

    def run(single_buffer_weights):
        out_pad, tn, n_pad, vmem_limit = _plan(
            N, H, out_dim, depth, input_norm, row_tile, single_buffer_weights)

        x_p = x2d if n_pad == N else jnp.pad(x2d, ((0, n_pad - N), (0, 0)))

        # Weights: bf16 MXU operands (halves weight VMEM residency); biases/LN f32.
        w_out = (jnp.zeros((H, out_pad), jnp.float32)
                 .at[:, :out_dim].set(params["w_out"])).astype(jnp.bfloat16)
        b_out = (jnp.zeros((1, out_pad), jnp.float32)
                 .at[:, :out_dim].set(params["b_out"]))

        def const_spec(a):
            # Full-array block, same block index every grid step -> stays resident.
            # Single-buffer it: no point double-buffering a constant operand.
            kwargs = {}
            if single_buffer_weights:
                kwargs["pipeline_mode"] = pl.Buffered(1)
            return pl.BlockSpec(a.shape, lambda i: (0,) * a.ndim, **kwargs)

        inputs = [x_p]
        in_specs = [pl.BlockSpec((tn, H), lambda i: (i, 0))]
        if input_norm:
            for a in (params["ln_w"], params["ln_b"]):
                inputs.append(a)
                in_specs.append(const_spec(a))
        for i in range(depth):
            wi = params["w"][i].astype(jnp.bfloat16)
            bi = params["b"][i]
            inputs += [wi, bi]
            in_specs += [const_spec(wi), const_spec(bi)]
        inputs += [w_out, b_out]
        in_specs += [const_spec(w_out), const_spec(b_out)]

        cost = pl.CostEstimate(
            flops=int(2 * N * H * (depth * H + out_pad)),
            transcendentals=int(N * H * depth),        # one erf per hidden activation
            bytes_accessed=int(n_pad * H * 4 + n_pad * out_pad * 4
                               + depth * H * H * 2 + H * out_pad * 2
                               + depth * H * 4 + out_pad * 4),
        )

        kernel = _make_mlp_kernel(depth, input_norm)
        return pl.pallas_call(
            kernel,
            out_shape=jax.ShapeDtypeStruct((n_pad, out_pad), jnp.float32),
            grid=(n_pad // tn,),
            in_specs=in_specs,
            out_specs=pl.BlockSpec((tn, out_pad), lambda i: (i, 0)),
            compiler_params=pltpu.CompilerParams(
                dimension_semantics=("parallel",),
                vmem_limit_bytes=vmem_limit,
            ),
            cost_estimate=cost,
        )(*inputs)

    try:
        out = jax.block_until_ready(run(single_buffer_weights=True))
    except Exception:
        # Fallback for JAX builds where pl.Buffered(1) constant-index specs are
        # not accepted: revert to default (double-buffered) resident specs.
        out = run(single_buffer_weights=False)
    return out[:N, :out_dim]


# ------------------------------- references ----------------------------------

def mlp_reference_f32(x2d, params, depth, input_norm):
    """Pure-JAX reference, full f32 math (module semantics)."""
    x = x2d
    if input_norm:
        x = _layer_norm(x, params["ln_w"], params["ln_b"])
    for i in range(depth):
        y = x @ params["w"][i] + params["b"][i]
        y = _gelu_exact(y)
        y = _layer_norm(y)
        x = x + y if i > 0 else y
    return x @ params["w_out"] + params["b_out"]


def mlp_reference_bf16(x2d, params, depth, input_norm):
    """Pure-JAX reference matching the kernel's bf16-matmul / f32-accumulate path."""
    x = x2d
    if input_norm:
        x = _layer_norm(x, params["ln_w"], params["ln_b"])
    for i in range(depth):
        w = params["w"][i].astype(jnp.bfloat16)
        y = jnp.dot(x.astype(jnp.bfloat16), w,
                    preferred_element_type=jnp.float32) + params["b"][i]
        y = _gelu_exact(y)
        y = _layer_norm(y)
        x = x + y if i > 0 else y
    w_out = params["w_out"].astype(jnp.bfloat16)
    return jnp.dot(x.astype(jnp.bfloat16), w_out,
                   preferred_element_type=jnp.float32) + params["b_out"]


def init_params(key, hidden_dim, output_dim, depth):
    n_keys = 2 + 2 * depth + 2
    keys = jax.random.split(key, n_keys)
    ki = iter(range(n_keys))
    p = {}
    p["ln_w"] = 1.0 + 0.1 * jax.random.normal(keys[next(ki)], (1, hidden_dim), jnp.float32)
    p["ln_b"] = 0.1 * jax.random.normal(keys[next(ki)], (1, hidden_dim), jnp.float32)
    p["w"], p["b"] = [], []
    for _ in range(depth):
        p["w"].append(0.1 * jax.random.normal(keys[next(ki)], (hidden_dim, hidden_dim), jnp.float32))
        p["b"].append(0.05 * jax.random.normal(keys[next(ki)], (1, hidden_dim), jnp.float32))
    p["w_out"] = 0.1 * jax.random.normal(keys[next(ki)], (hidden_dim, output_dim), jnp.float32)
    p["b_out"] = 0.05 * jax.random.normal(keys[next(ki)], (1, output_dim), jnp.float32)
    return p


if __name__ == "__main__":
    hidden_dim, output_dim, depth = 32, 16, 2
    input_norm = True
    batch, seq = 2, 8

    root = jax.random.PRNGKey(0)
    k_x, k_p = jax.random.split(root, 2)

    x = jax.random.normal(k_x, (batch, seq, hidden_dim), jnp.float32)
    params = init_params(k_p, hidden_dim, output_dim, depth)

    x2d = x.reshape(batch * seq, hidden_dim)
    out2d = mlp_forward(x2d, params, depth, input_norm)
    out2d = jax.block_until_ready(out2d)
    out = out2d.reshape(batch, seq, output_dim)
    assert out.shape == (batch, seq, output_dim)

    # Tight check vs a reference using the same bf16-matmul / f32-accumulate path.
    ref_bf16 = mlp_reference_bf16(x2d, params, depth, input_norm).reshape(batch, seq, output_dim)
    assert jnp.allclose(out, ref_bf16, atol=1e-3, rtol=1e-3), \
        "mismatch vs bf16-matched pure-JAX reference"

    # Loose sanity check vs the full-f32 module semantics (bf16 MXU operands
    # are a deliberate, documented precision trade-off per the perf review).
    ref_f32 = mlp_reference_f32(x2d, params, depth, input_norm).reshape(batch, seq, output_dim)
    assert jnp.allclose(out, ref_f32, atol=5e-2, rtol=5e-2), \
        "mismatch vs f32 pure-JAX reference"

    print("KERNEL_OK")
</pallas_src>

<mosaic_0001>
module attributes {stable_mosaic.version = 11 : i64} {
  func.func @kernel(%arg0: i32, %arg1: memref<16x32xf32, #tpu.memory_space<vmem>>, %arg2: memref<1x32xf32, #tpu.memory_space<vmem>>, %arg3: memref<1x32xf32, #tpu.memory_space<vmem>>, %arg4: memref<32x32xbf16, #tpu.memory_space<vmem>>, %arg5: memref<1x32xf32, #tpu.memory_space<vmem>>, %arg6: memref<32x32xbf16, #tpu.memory_space<vmem>>, %arg7: memref<1x32xf32, #tpu.memory_space<vmem>>, %arg8: memref<32x128xbf16, #tpu.memory_space<vmem>>, %arg9: memref<1x128xf32, #tpu.memory_space<vmem>>, %arg10: memref<16x128xf32, #tpu.memory_space<vmem>>) attributes {dimension_semantics = [#tpu.dimension_semantics<parallel>], iteration_bounds = array<i64: 1>, scalar_prefetch = 0 : i64, scratch_operands = 0 : i64, tpu.core_type = #tpu.core_type<tc>, window_params = [{transform_indices = @transform_0, window_bounds = array<i64: 16, 32>}, {pipeline_mode = #tpu.pipeline_mode<synchronous>, transform_indices = @transform_1, window_bounds = array<i64: 1, 32>}, {pipeline_mode = #tpu.pipeline_mode<synchronous>, transform_indices = @transform_2, window_bounds = array<i64: 1, 32>}, {pipeline_mode = #tpu.pipeline_mode<synchronous>, transform_indices = @transform_3, window_bounds = array<i64: 32, 32>}, {pipeline_mode = #tpu.pipeline_mode<synchronous>, transform_indices = @transform_4, window_bounds = array<i64: 1, 32>}, {pipeline_mode = #tpu.pipeline_mode<synchronous>, transform_indices = @transform_5, window_bounds = array<i64: 32, 32>}, {pipeline_mode = #tpu.pipeline_mode<synchronous>, transform_indices = @transform_6, window_bounds = array<i64: 1, 32>}, {pipeline_mode = #tpu.pipeline_mode<synchronous>, transform_indices = @transform_7, window_bounds = array<i64: 32, 128>}, {pipeline_mode = #tpu.pipeline_mode<synchronous>, transform_indices = @transform_8, window_bounds = array<i64: 1, 128>}, {transform_indices = @transform_9, window_bounds = array<i64: 16, 128>}]} {
    %c0 = arith.constant 0 : index
    %c0_0 = arith.constant 0 : index
    %0 = vector.load %arg1[%c0, %c0_0] : memref<16x32xf32, #tpu.memory_space<vmem>>, vector<16x32xf32>
    %c0_1 = arith.constant 0 : index
    %c0_2 = arith.constant 0 : index
    %1 = vector.load %arg2[%c0_1, %c0_2] : memref<1x32xf32, #tpu.memory_space<vmem>>, vector<1x32xf32>
    %c0_3 = arith.constant 0 : index
    %c0_4 = arith.constant 0 : index
    %2 = vector.load %arg3[%c0_3, %c0_4] : memref<1x32xf32, #tpu.memory_space<vmem>>, vector<1x32xf32>
    %cst = arith.constant dense<0.000000e+00> : vector<16xf32>
    %3 = vector.multi_reduction <add>, %0, %cst [1] : vector<16x32xf32> to vector<16xf32>
    %4 = vector.shape_cast %3 : vector<16xf32> to vector<16x1xf32>
    %cst_5 = arith.constant 3.200000e+01 : f32
    %5 = vector.broadcast %cst_5 : f32 to vector<16x1xf32>
    %6 = arith.divf %4, %5 : vector<16x1xf32>
    %7 = arith.mulf %0, %0 : vector<16x32xf32>
    %cst_6 = arith.constant dense<0.000000e+00> : vector<16xf32>
    %8 = vector.multi_reduction <add>, %7, %cst_6 [1] : vector<16x32xf32> to vector<16xf32>
    %9 = vector.shape_cast %8 : vector<16xf32> to vector<16x1xf32>
    %cst_7 = arith.constant 3.200000e+01 : f32
    %10 = vector.broadcast %cst_7 : f32 to vector<16x1xf32>
    %11 = arith.divf %9, %10 : vector<16x1xf32>
    %12 = arith.mulf %6, %6 : vector<16x1xf32>
    %13 = arith.subf %11, %12 : vector<16x1xf32>
    %cst_8 = arith.constant 0.000000e+00 : f32
    %14 = vector.broadcast %cst_8 : f32 to vector<16x1xf32>
    %15 = arith.maximumf %13, %14 : vector<16x1xf32>
    %16 = vector.broadcast %6 : vector<16x1xf32> to vector<16x32xf32>
    %17 = arith.subf %0, %16 : vector<16x32xf32>
    %cst_9 = arith.constant 9.99999974E-6 : f32
    %18 = vector.broadcast %cst_9 : f32 to vector<16x1xf32>
    %19 = arith.addf %15, %18 : vector<16x1xf32>
    %20 = math.rsqrt %19 : vector<16x1xf32>
    %21 = vector.broadcast %20 : vector<16x1xf32> to vector<16x32xf32>
    %22 = arith.mulf %17, %21 : vector<16x32xf32>
    %23 = vector.broadcast %1 : vector<1x32xf32> to vector<16x32xf32>
    %24 = arith.mulf %22, %23 : vector<16x32xf32>
    %25 = vector.broadcast %2 : vector<1x32xf32> to vector<16x32xf32>
    %26 = arith.addf %24, %25 : vector<16x32xf32>
    %c0_10 = arith.constant 0 : index
    %c0_11 = arith.constant 0 : index
    %27 = vector.load %arg4[%c0_10, %c0_11] : memref<32x32xbf16, #tpu.memory_space<vmem>>, vector<32x32xbf16>
    %c0_12 = arith.constant 0 : index
    %c0_13 = arith.constant 0 : index
    %28 = vector.load %arg5[%c0_12, %c0_13] : memref<1x32xf32, #tpu.memory_space<vmem>>, vector<1x32xf32>
    %29 = arith.truncf %26 : vector<16x32xf32> to vector<16x32xbf16>
    %cst_14 = arith.constant dense<0.000000e+00> : vector<16x32xf32>
    %30 = tpu.matmul %29, %27, %cst_14 {dimension_numbers = #tpu.dot_dimension_numbers<[1], [0], [0], [1], [0, 0, 1, 1], [], []>} : vector<16x32xbf16>, vector<32x32xbf16>, vector<16x32xf32> -> vector<16x32xf32>
    %31 = vector.broadcast %28 : vector<1x32xf32> to vector<16x32xf32>
    %32 = arith.addf %30, %31 : vector<16x32xf32>
    %cst_15 = arith.constant 5.000000e-01 : f32
    %33 = vector.broadcast %cst_15 : f32 to vector<16x32xf32>
    %34 = arith.mulf %33, %32 : vector<16x32xf32>
    %cst_16 = arith.constant 0.707106769 : f32
    %35 = vector.broadcast %cst_16 : f32 to vector<16x32xf32>
    %36 = arith.mulf %32, %35 : vector<16x32xf32>
    %37 = math.erf %36 : vector<16x32xf32>
    %cst_17 = arith.constant 1.000000e+00 : f32
    %38 = vector.broadcast %cst_17 : f32 to vector<16x32xf32>
    %39 = arith.addf %38, %37 : vector<16x32xf32>
    %40 = arith.mulf %34, %39 : vector<16x32xf32>
    %cst_18 = arith.constant dense<0.000000e+00> : vector<16xf32>
    %41 = vector.multi_reduction <add>, %40, %cst_18 [1] : vector<16x32xf32> to vector<16xf32>
    %42 = vector.shape_cast %41 : vector<16xf32> to vector<16x1xf32>
    %cst_19 = arith.constant 3.200000e+01 : f32
    %43 = vector.broadcast %cst_19 : f32 to vector<16x1xf32>
    %44 = arith.divf %42, %43 : vector<16x1xf32>
    %45 = arith.mulf %40, %40 : vector<16x32xf32>
    %cst_20 = arith.constant dense<0.000000e+00> : vector<16xf32>
    %46 = vector.multi_reduction <add>, %45, %cst_20 [1] : vector<16x32xf32> to vector<16xf32>
    %47 = vector.shape_cast %46 : vector<16xf32> to vector<16x1xf32>
    %cst_21 = arith.constant 3.200000e+01 : f32
    %48 = vector.broadcast %cst_21 : f32 to vector<16x1xf32>
    %49 = arith.divf %47, %48 : vector<16x1xf32>
    %50 = arith.mulf %44, %44 : vector<16x1xf32>
    %51 = arith.subf %49, %50 : vector<16x1xf32>
    %cst_22 = arith.constant 0.000000e+00 : f32
    %52 = vector.broadcast %cst_22 : f32 to vector<16x1xf32>
    %53 = arith.maximumf %51, %52 : vector<16x1xf32>
    %54 = vector.broadcast %44 : vector<16x1xf32> to vector<16x32xf32>
    %55 = arith.subf %40, %54 : vector<16x32xf32>
    %cst_23 = arith.constant 9.99999974E-6 : f32
    %56 = vector.broadcast %cst_23 : f32 to vector<16x1xf32>
    %57 = arith.addf %53, %56 : vector<16x1xf32>
    %58 = math.rsqrt %57 : vector<16x1xf32>
    %59 = vector.broadcast %58 : vector<16x1xf32> to vector<16x32xf32>
    %60 = arith.mulf %55, %59 : vector<16x32xf32>
    %c0_24 = arith.constant 0 : index
    %c0_25 = arith.constant 0 : index
    %61 = vector.load %arg6[%c0_24, %c0_25] : memref<32x32xbf16, #tpu.memory_space<vmem>>, vector<32x32xbf16>
    %c0_26 = arith.constant 0 : index
    %c0_27 = arith.constant 0 : index
    %62 = vector.load %arg7[%c0_26, %c0_27] : memref<1x32xf32, #tpu.memory_space<vmem>>, vector<1x32xf32>
    %63 = arith.truncf %60 : vector<16x32xf32> to vector<16x32xbf16>
    %cst_28 = arith.constant dense<0.000000e+00> : vector<16x32xf32>
    %64 = tpu.matmul %63, %61, %cst_28 {dimension_numbers = #tpu.dot_dimension_numbers<[1], [0], [0], [1], [0, 0, 1, 1], [], []>} : vector<16x32xbf16>, vector<32x32xbf16>, vector<16x32xf32> -> vector<16x32xf32>
    %65 = vector.broadcast %62 : vector<1x32xf32> to vector<16x32xf32>
    %66 = arith.addf %64, %65 : vector<16x32xf32>
    %cst_29 = arith.constant 5.000000e-01 : f32
    %67 = vector.broadcast %cst_29 : f32 to vector<16x32xf32>
    %68 = arith.mulf %67, %66 : vector<16x32xf32>
    %cst_30 = arith.constant 0.707106769 : f32
    %69 = vector.broadcast %cst_30 : f32 to vector<16x32xf32>
    %70 = arith.mulf %66, %69 : vector<16x32xf32>
    %71 = math.erf %70 : vector<16x32xf32>
    %cst_31 = arith.constant 1.000000e+00 : f32
    %72 = vector.broadcast %cst_31 : f32 to vector<16x32xf32>
    %73 = arith.addf %72, %71 : vector<16x32xf32>
    %74 = arith.mulf %68, %73 : vector<16x32xf32>
    %cst_32 = arith.constant dense<0.000000e+00> : vector<16xf32>
    %75 = vector.multi_reduction <add>, %74, %cst_32 [1] : vector<16x32xf32> to vector<16xf32>
    %76 = vector.shape_cast %75 : vector<16xf32> to vector<16x1xf32>
    %cst_33 = arith.constant 3.200000e+01 : f32
    %77 = vector.broadcast %cst_33 : f32 to vector<16x1xf32>
    %78 = arith.divf %76, %77 : vector<16x1xf32>
    %79 = arith.mulf %74, %74 : vector<16x32xf32>
    %cst_34 = arith.constant dense<0.000000e+00> : vector<16xf32>
    %80 = vector.multi_reduction <add>, %79, %cst_34 [1] : vector<16x32xf32> to vector<16xf32>
    %81 = vector.shape_cast %80 : vector<16xf32> to vector<16x1xf32>
    %cst_35 = arith.constant 3.200000e+01 : f32
    %82 = vector.broadcast %cst_35 : f32 to vector<16x1xf32>
    %83 = arith.divf %81, %82 : vector<16x1xf32>
    %84 = arith.mulf %78, %78 : vector<16x1xf32>
    %85 = arith.subf %83, %84 : vector<16x1xf32>
    %cst_36 = arith.constant 0.000000e+00 : f32
    %86 = vector.broadcast %cst_36 : f32 to vector<16x1xf32>
    %87 = arith.maximumf %85, %86 : vector<16x1xf32>
    %88 = vector.broadcast %78 : vector<16x1xf32> to vector<16x32xf32>
    %89 = arith.subf %74, %88 : vector<16x32xf32>
    %cst_37 = arith.constant 9.99999974E-6 : f32
    %90 = vector.broadcast %cst_37 : f32 to vector<16x1xf32>
    %91 = arith.addf %87, %90 : vector<16x1xf32>
    %92 = math.rsqrt %91 : vector<16x1xf32>
    %93 = vector.broadcast %92 : vector<16x1xf32> to vector<16x32xf32>
    %94 = arith.mulf %89, %93 : vector<16x32xf32>
    %95 = arith.addf %60, %94 : vector<16x32xf32>
    %c0_38 = arith.constant 0 : index
    %c0_39 = arith.constant 0 : index
    %96 = vector.load %arg8[%c0_38, %c0_39] : memref<32x128xbf16, #tpu.memory_space<vmem>>, vector<32x128xbf16>
    %c0_40 = arith.constant 0 : index
    %c0_41 = arith.constant 0 : index
    %97 = vector.load %arg9[%c0_40, %c0_41] : memref<1x128xf32, #tpu.memory_space<vmem>>, vector<1x128xf32>
    %98 = arith.truncf %95 : vector<16x32xf32> to vector<16x32xbf16>
    %cst_42 = arith.constant dense<0.000000e+00> : vector<16x128xf32>
    %99 = tpu.matmul %98, %96, %cst_42 {dimension_numbers = #tpu.dot_dimension_numbers<[1], [0], [0], [1], [0, 0, 1, 1], [], []>} : vector<16x32xbf16>, vector<32x128xbf16>, vector<16x128xf32> -> vector<16x128xf32>
    %100 = vector.broadcast %97 : vector<1x128xf32> to vector<16x128xf32>
    %101 = arith.addf %99, %100 : vector<16x128xf32>
    %c0_43 = arith.constant 0 : index
    %c0_44 = arith.constant 0 : index
    %102 = vector.load %arg10[%c0_43, %c0_44] : memref<16x128xf32, #tpu.memory_space<vmem>>, vector<16x128xf32>
    tpu.vector_store %arg10[%c0_43, %c0_44], %101 {strides = array<i32>} : memref<16x128xf32, #tpu.memory_space<vmem>>, vector<16x128xf32>,
    return
  }
  func.func @transform_0(%arg0: i32) -> (i32, i32) {
    %c0_i32 = arith.constant 0 : i32
    %c0_i32_0 = arith.constant 0 : i32
    return %arg0, %c0_i32 : i32, i32
  }
  func.func @transform_1(%arg0: i32) -> (i32, i32) {
    %c0_i32 = arith.constant 0 : i32
    %c0_i32_0 = arith.constant 0 : i32
    %c0_i32_1 = arith.constant 0 : i32
    return %c0_i32, %c0_i32_0 : i32, i32
  }
  func.func @transform_2(%arg0: i32) -> (i32, i32) {
    %c0_i32 = arith.constant 0 : i32
    %c0_i32_0 = arith.constant 0 : i32
    %c0_i32_1 = arith.constant 0 : i32
    return %c0_i32, %c0_i32_0 : i32, i32
  }
  func.func @transform_3(%arg0: i32) -> (i32, i32) {
    %c0_i32 = arith.constant 0 : i32
    %c0_i32_0 = arith.constant 0 : i32
    %c0_i32_1 = arith.constant 0 : i32
    return %c0_i32, %c0_i32_0 : i32, i32
  }
  func.func @transform_4(%arg0: i32) -> (i32, i32) {
    %c0_i32 = arith.constant 0 : i32
    %c0_i32_0 = arith.constant 0 : i32
    %c0_i32_1 = arith.constant 0 : i32
    return %c0_i32, %c0_i32_0 : i32, i32
  }
  func.func @transform_5(%arg0: i32) -> (i32, i32) {
    %c0_i32 = arith.constant 0 : i32
    %c0_i32_0 = arith.constant 0 : i32
    %c0_i32_1 = arith.constant 0 : i32
    return %c0_i32, %c0_i32_0 : i32, i32
  }
  func.func @transform_6(%arg0: i32) -> (i32, i32) {
    %c0_i32 = arith.constant 0 : i32
    %c0_i32_0 = arith.constant 0 : i32
    %c0_i32_1 = arith.constant 0 : i32
    return %c0_i32, %c0_i32_0 : i32, i32
  }
  func.func @transform_7(%arg0: i32) -> (i32, i32) {
    %c0_i32 = arith.constant 0 : i32
    %c0_i32_0 = arith.constant 0 : i32
    %c0_i32_1 = arith.constant 0 : i32
    return %c0_i32, %c0_i32_0 : i32, i32
  }
  func.func @transform_8(%arg0: i32) -> (i32, i32) {
    %c0_i32 = arith.constant 0 : i32
    %c0_i32_0 = arith.constant 0 : i32
    %c0_i32_1 = arith.constant 0 : i32
    return %c0_i32, %c0_i32_0 : i32, i32
  }
  func.func @transform_9(%arg0: i32) -> (i32, i32) {
    %c0_i32 = arith.constant 0 : i32
    %c0_i32_0 = arith.constant 0 : i32
    return %arg0, %c0_i32 : i32, i32
  }
}

module attributes {stable_mosaic.version = 11 : i64} {
  func.func @kernel(%arg0: i32, %arg1: memref<16x32xf32, #tpu.memory_space<vmem>>, %arg2: memref<1x32xf32, #tpu.memory_space<vmem>>, %arg3: memref<1x32xf32, #tpu.memory_space<vmem>>, %arg4: memref<32x32xbf16, #tpu.memory_space<vmem>>, %arg5: memref<1x32xf32, #tpu.memory_space<vmem>>, %arg6: memref<32x32xbf16, #tpu.memory_space<vmem>>, %arg7: memref<1x32xf32, #tpu.memory_space<vmem>>, %arg8: memref<32x128xbf16, #tpu.memory_space<vmem>>, %arg9: memref<1x128xf32, #tpu.memory_space<vmem>>, %arg10: memref<16x128xf32, #tpu.memory_space<vmem>>) attributes {dimension_semantics = [#tpu.dimension_semantics<parallel>], iteration_bounds = array<i64: 1>, scalar_prefetch = 0 : i64, scratch_operands = 0 : i64, tpu.core_type = #tpu.core_type<tc>, window_params = [{transform_indices = @transform_0, window_bounds = array<i64: 16, 32>}, {pipeline_mode = #tpu.pipeline_mode<synchronous>, transform_indices = @transform_1, window_bounds = array<i64: 1, 32>}, {pipeline_mode = #tpu.pipeline_mode<synchronous>, transform_indices = @transform_2, window_bounds = array<i64: 1, 32>}, {pipeline_mode = #tpu.pipeline_mode<synchronous>, transform_indices = @transform_3, window_bounds = array<i64: 32, 32>}, {pipeline_mode = #tpu.pipeline_mode<synchronous>, transform_indices = @transform_4, window_bounds = array<i64: 1, 32>}, {pipeline_mode = #tpu.pipeline_mode<synchronous>, transform_indices = @transform_5, window_bounds = array<i64: 32, 32>}, {pipeline_mode = #tpu.pipeline_mode<synchronous>, transform_indices = @transform_6, window_bounds = array<i64: 1, 32>}, {pipeline_mode = #tpu.pipeline_mode<synchronous>, transform_indices = @transform_7, window_bounds = array<i64: 32, 128>}, {pipeline_mode = #tpu.pipeline_mode<synchronous>, transform_indices = @transform_8, window_bounds = array<i64: 1, 128>}, {transform_indices = @transform_9, window_bounds = array<i64: 16, 128>}]} {
    %c0 = arith.constant 0 : index
    %c0_0 = arith.constant 0 : index
    %0 = vector.load %arg1[%c0, %c0_0] : memref<16x32xf32, #tpu.memory_space<vmem>>, vector<16x32xf32>
    %c0_1 = arith.constant 0 : index
    %c0_2 = arith.constant 0 : index
    %1 = vector.load %arg2[%c0_1, %c0_2] : memref<1x32xf32, #tpu.memory_space<vmem>>, vector<1x32xf32>
    %c0_3 = arith.constant 0 : index
    %c0_4 = arith.constant 0 : index
    %2 = vector.load %arg3[%c0_3, %c0_4] : memref<1x32xf32, #tpu.memory_space<vmem>>, vector<1x32xf32>
    %cst = arith.constant dense<0.000000e+00> : vector<16xf32>
    %3 = vector.multi_reduction <add>, %0, %cst [1] : vector<16x32xf32> to vector<16xf32>
    %4 = vector.shape_cast %3 : vector<16xf32> to vector<16x1xf32>
    %cst_5 = arith.constant 3.200000e+01 : f32
    %5 = vector.broadcast %cst_5 : f32 to vector<16x1xf32>
    %6 = arith.divf %4, %5 : vector<16x1xf32>
    %7 = arith.mulf %0, %0 : vector<16x32xf32>
    %cst_6 = arith.constant dense<0.000000e+00> : vector<16xf32>
    %8 = vector.multi_reduction <add>, %7, %cst_6 [1] : vector<16x32xf32> to vector<16xf32>
    %9 = vector.shape_cast %8 : vector<16xf32> to vector<16x1xf32>
    %cst_7 = arith.constant 3.200000e+01 : f32
    %10 = vector.broadcast %cst_7 : f32 to vector<16x1xf32>
    %11 = arith.divf %9, %10 : vector<16x1xf32>
    %12 = arith.mulf %6, %6 : vector<16x1xf32>
    %13 = arith.subf %11, %12 : vector<16x1xf32>
    %cst_8 = arith.constant 0.000000e+00 : f32
    %14 = vector.broadcast %cst_8 : f32 to vector<16x1xf32>
    %15 = arith.maximumf %13, %14 : vector<16x1xf32>
    %16 = vector.broadcast %6 : vector<16x1xf32> to vector<16x32xf32>
    %17 = arith.subf %0, %16 : vector<16x32xf32>
    %cst_9 = arith.constant 9.99999974E-6 : f32
    %18 = vector.broadcast %cst_9 : f32 to vector<16x1xf32>
    %19 = arith.addf %15, %18 : vector<16x1xf32>
    %20 = math.rsqrt %19 : vector<16x1xf32>
    %21 = vector.broadcast %20 : vector<16x1xf32> to vector<16x32xf32>
    %22 = arith.mulf %17, %21 : vector<16x32xf32>
    %23 = vector.broadcast %1 : vector<1x32xf32> to vector<16x32xf32>
    %24 = arith.mulf %22, %23 : vector<16x32xf32>
    %25 = vector.broadcast %2 : vector<1x32xf32> to vector<16x32xf32>
    %26 = arith.addf %24, %25 : vector<16x32xf32>
    %c0_10 = arith.constant 0 : index
    %c0_11 = arith.constant 0 : index
    %27 = vector.load %arg4[%c0_10, %c0_11] : memref<32x32xbf16, #tpu.memory_space<vmem>>, vector<32x32xbf16>
    %c0_12 = arith.constant 0 : index
    %c0_13 = arith.constant 0 : index
    %28 = vector.load %arg5[%c0_12, %c0_13] : memref<1x32xf32, #tpu.memory_space<vmem>>, vector<1x32xf32>
    %29 = arith.truncf %26 : vector<16x32xf32> to vector<16x32xbf16>
    %cst_14 = arith.constant dense<0.000000e+00> : vector<16x32xf32>
    %30 = tpu.matmul %29, %27, %cst_14 {dimension_numbers = #tpu.dot_dimension_numbers<[1], [0], [0], [1], [0, 0, 1, 1], [], []>} : vector<16x32xbf16>, vector<32x32xbf16>, vector<16x32xf32> -> vector<16x32xf32>
    %31 = vector.broadcast %28 : vector<1x32xf32> to vector<16x32xf32>
    %32 = arith.addf %30, %31 : vector<16x32xf32>
    %cst_15 = arith.constant 5.000000e-01 : f32
    %33 = vector.broadcast %cst_15 : f32 to vector<16x32xf32>
    %34 = arith.mulf %33, %32 : vector<16x32xf32>
    %cst_16 = arith.constant 0.707106769 : f32
    %35 = vector.broadcast %cst_16 : f32 to vector<16x32xf32>
    %36 = arith.mulf %32, %35 : vector<16x32xf32>
    %37 = math.erf %36 : vector<16x32xf32>
    %cst_17 = arith.constant 1.000000e+00 : f32
    %38 = vector.broadcast %cst_17 : f32 to vector<16x32xf32>
    %39 = arith.addf %38, %37 : vector<16x32xf32>
    %40 = arith.mulf %34, %39 : vector<16x32xf32>
    %cst_18 = arith.constant dense<0.000000e+00> : vector<16xf32>
    %41 = vector.multi_reduction <add>, %40, %cst_18 [1] : vector<16x32xf32> to vector<16xf32>
    %42 = vector.shape_cast %41 : vector<16xf32> to vector<16x1xf32>
    %cst_19 = arith.constant 3.200000e+01 : f32
    %43 = vector.broadcast %cst_19 : f32 to vector<16x1xf32>
    %44 = arith.divf %42, %43 : vector<16x1xf32>
    %45 = arith.mulf %40, %40 : vector<16x32xf32>
    %cst_20 = arith.constant dense<0.000000e+00> : vector<16xf32>
    %46 = vector.multi_reduction <add>, %45, %cst_20 [1] : vector<16x32xf32> to vector<16xf32>
    %47 = vector.shape_cast %46 : vector<16xf32> to vector<16x1xf32>
    %cst_21 = arith.constant 3.200000e+01 : f32
    %48 = vector.broadcast %cst_21 : f32 to vector<16x1xf32>
    %49 = arith.divf %47, %48 : vector<16x1xf32>
    %50 = arith.mulf %44, %44 : vector<16x1xf32>
    %51 = arith.subf %49, %50 : vector<16x1xf32>
    %cst_22 = arith.constant 0.000000e+00 : f32
    %52 = vector.broadcast %cst_22 : f32 to vector<16x1xf32>
    %53 = arith.maximumf %51, %52 : vector<16x1xf32>
    %54 = vector.broadcast %44 : vector<16x1xf32> to vector<16x32xf32>
    %55 = arith.subf %40, %54 : vector<16x32xf32>
    %cst_23 = arith.constant 9.99999974E-6 : f32
    %56 = vector.broadcast %cst_23 : f32 to vector<16x1xf32>
    %57 = arith.addf %53, %56 : vector<16x1xf32>
    %58 = math.rsqrt %57 : vector<16x1xf32>
    %59 = vector.broadcast %58 : vector<16x1xf32> to vector<16x32xf32>
    %60 = arith.mulf %55, %59 : vector<16x32xf32>
    %c0_24 = arith.constant 0 : index
    %c0_25 = arith.constant 0 : index
    %61 = vector.load %arg6[%c0_24, %c0_25] : memref<32x32xbf16, #tpu.memory_space<vmem>>, vector<32x32xbf16>
    %c0_26 = arith.constant 0 : index
    %c0_27 = arith.constant 0 : index
    %62 = vector.load %arg7[%c0_26, %c0_27] : memref<1x32xf32, #tpu.memory_space<vmem>>, vector<1x32xf32>
    %63 = arith.truncf %60 : vector<16x32xf32> to vector<16x32xbf16>
    %cst_28 = arith.constant dense<0.000000e+00> : vector<16x32xf32>
    %64 = tpu.matmul %63, %61, %cst_28 {dimension_numbers = #tpu.dot_dimension_numbers<[1], [0], [0], [1], [0, 0, 1, 1], [], []>} : vector<16x32xbf16>, vector<32x32xbf16>, vector<16x32xf32> -> vector<16x32xf32>
    %65 = vector.broadcast %62 : vector<1x32xf32> to vector<16x32xf32>
    %66 = arith.addf %64, %65 : vector<16x32xf32>
    %cst_29 = arith.constant 5.000000e-01 : f32
    %67 = vector.broadcast %cst_29 : f32 to vector<16x32xf32>
    %68 = arith.mulf %67, %66 : vector<16x32xf32>
    %cst_30 = arith.constant 0.707106769 : f32
    %69 = vector.broadcast %cst_30 : f32 to vector<16x32xf32>
    %70 = arith.mulf %66, %69 : vector<16x32xf32>
    %71 = math.erf %70 : vector<16x32xf32>
    %cst_31 = arith.constant 1.000000e+00 : f32
    %72 = vector.broadcast %cst_31 : f32 to vector<16x32xf32>
    %73 = arith.addf %72, %71 : vector<16x32xf32>
    %74 = arith.mulf %68, %73 : vector<16x32xf32>
    %cst_32 = arith.constant dense<0.000000e+00> : vector<16xf32>
    %75 = vector.multi_reduction <add>, %74, %cst_32 [1] : vector<16x32xf32> to vector<16xf32>
    %76 = vector.shape_cast %75 : vector<16xf32> to vector<16x1xf32>
    %cst_33 = arith.constant 3.200000e+01 : f32
    %77 = vector.broadcast %cst_33 : f32 to vector<16x1xf32>
    %78 = arith.divf %76, %77 : vector<16x1xf32>
    %79 = arith.mulf %74, %74 : vector<16x32xf32>
    %cst_34 = arith.constant dense<0.000000e+00> : vector<16xf32>
    %80 = vector.multi_reduction <add>, %79, %cst_34 [1] : vector<16x32xf32> to vector<16xf32>
    %81 = vector.shape_cast %80 : vector<16xf32> to vector<16x1xf32>
    %cst_35 = arith.constant 3.200000e+01 : f32
    %82 = vector.broadcast %cst_35 : f32 to vector<16x1xf32>
    %83 = arith.divf %81, %82 : vector<16x1xf32>
    %84 = arith.mulf %78, %78 : vector<16x1xf32>
    %85 = arith.subf %83, %84 : vector<16x1xf32>
    %cst_36 = arith.constant 0.000000e+00 : f32
    %86 = vector.broadcast %cst_36 : f32 to vector<16x1xf32>
    %87 = arith.maximumf %85, %86 : vector<16x1xf32>
    %88 = vector.broadcast %78 : vector<16x1xf32> to vector<16x32xf32>
    %89 = arith.subf %74, %88 : vector<16x32xf32>
    %cst_37 = arith.constant 9.99999974E-6 : f32
    %90 = vector.broadcast %cst_37 : f32 to vector<16x1xf32>
    %91 = arith.addf %87, %90 : vector<16x1xf32>
    %92 = math.rsqrt %91 : vector<16x1xf32>
    %93 = vector.broadcast %92 : vector<16x1xf32> to vector<16x32xf32>
    %94 = arith.mulf %89, %93 : vector<16x32xf32>
    %95 = arith.addf %60, %94 : vector<16x32xf32>
    %c0_38 = arith.constant 0 : index
    %c0_39 = arith.constant 0 : index
    %96 = vector.load %arg8[%c0_38, %c0_39] : memref<32x128xbf16, #tpu.memory_space<vmem>>, vector<32x128xbf16>
    %c0_40 = arith.constant 0 : index
    %c0_41 = arith.constant 0 : index
    %97 = vector.load %arg9[%c0_40, %c0_41] : memref<1x128xf32, #tpu.memory_space<vmem>>, vector<1x128xf32>
    %98 = arith.truncf %95 : vector<16x32xf32> to vector<16x32xbf16>
    %cst_42 = arith.constant dense<0.000000e+00> : vector<16x128xf32>
    %99 = tpu.matmul %98, %96, %cst_42 {dimension_numbers = #tpu.dot_dimension_numbers<[1], [0], [0], [1], [0, 0, 1, 1], [], []>} : vector<16x32xbf16>, vector<32x128xbf16>, vector<16x128xf32> -> vector<16x128xf32>
    %100 = vector.broadcast %97 : vector<1x128xf32> to vector<16x128xf32>
    %101 = arith.addf %99, %100 : vector<16x128xf32>
    %c0_43 = arith.constant 0 : index
    %c0_44 = arith.constant 0 : index
    %102 = vector.load %arg10[%c0_43, %c0_44] : memref<16x128xf32, #tpu.memory_space<vmem>>, vector<16x128xf32>
    tpu.vector_store %arg10[%c0_43, %c0_44], %101 {strides = array<i32>} : memref<16x128xf32, #tpu.memory_space<vmem>>, vector<16x128xf32>,
    return
  }
  func.func @transform_0(%arg0: i32) -> (i32, i32) {
    %c0_i32 = arith.constant 0 : i32
    %c0_i32_0 = arith.constant 0 : i32
    return %arg0, %c0_i32 : i32, i32
  }
  func.func @transform_1(%arg0: i32) -> (i32, i32) {
    %c0_i32 = arith.constant 0 : i32
    %c0_i32_0 = arith.constant 0 : i32
    %c0_i32_1 = arith.constant 0 : i32
    return %c0_i32, %c0_i32_0 : i32, i32
  }
  func.func @transform_2(%arg0: i32) -> (i32, i32) {
    %c0_i32 = arith.constant 0 : i32
    %c0_i32_0 = arith.constant 0 : i32
    %c0_i32_1 = arith.constant 0 : i32
    return %c0_i32, %c0_i32_0 : i32, i32
  }
  func.func @transform_3(%arg0: i32) -> (i32, i32) {
    %c0_i32 = arith.constant 0 : i32
    %c0_i32_0 = arith.constant 0 : i32
    %c0_i32_1 = arith.constant 0 : i32
    return %c0_i32, %c0_i32_0 : i32, i32
  }
  func.func @transform_4(%arg0: i32) -> (i32, i32) {
    %c0_i32 = arith.constant 0 : i32
    %c0_i32_0 = arith.constant 0 : i32
    %c0_i32_1 = arith.constant 0 : i32
    return %c0_i32, %c0_i32_0 : i32, i32
  }
  func.func @transform_5(%arg0: i32) -> (i32, i32) {
    %c0_i32 = arith.constant 0 : i32
    %c0_i32_0 = arith.constant 0 : i32
    %c0_i32_1 = arith.constant 0 : i32
    return %c0_i32, %c0_i32_0 : i32, i32
  }
  func.func @transform_6(%arg0: i32) -> (i32, i32) {
    %c0_i32 = arith.constant 0 : i32
    %c0_i32_0 = arith.constant 0 : i32
    %c0_i32_1 = arith.constant 0 : i32
    return %c0_i32, %c0_i32_0 : i32, i32
  }
  func.func @transform_7(%arg0: i32) -> (i32, i32) {
    %c0_i32 = arith.constant 0 : i32
    %c0_i32_0 = arith.constant 0 : i32
    %c0_i32_1 = arith.constant 0 : i32
    return %c0_i32, %c0_i32_0 : i32, i32
  }
  func.func @transform_8(%arg0: i32) -> (i32, i32) {
    %c0_i32 = arith.constant 0 : i32
    %c0_i32_0 = arith.constant 0 : i32
    %c0_i32_1 = arith.constant 0 : i32
    return %c0_i32, %c0_i32_0 : i32, i32
  }
  func.func @transform_9(%arg0: i32) -> (i32, i32) {
    %c0_i32 = arith.constant 0 : i32
    %c0_i32_0 = arith.constant 0 : i32
    return %arg0, %c0_i32 : i32, i32
  }
}

</mosaic_0001>

<bundles_post_ra>
// kernel: tpu_custom_call.1
= control target key start
LH: loop header
LB: loop body
LE: loop exit
PB: predicated region body
PF: predicated region fallthrough
CT: control target
= control target key end

     0   :  { %14 = vsyncpa [#allocation3], 0  ;;  %s839_s0 = inlined_call_operand.hbm [shape: f32[16,32], index: 0, kind: input, shape index: {}]   ;;  %s840_s1 = inlined_call_operand.vmem [shape: f32[1,32], index: 1, kind: input, shape index: {}]   ;;  %s841_s2 = inlined_call_operand.vmem [shape: f32[1,32], index: 2, kind: input, shape index: {}]   ;;  %s842_s3 = inlined_call_operand.hbm [shape: bf16[32,32], index: 3, kind: input, shape index: {}]   ;;  %s843_s4 = inlined_call_operand.hbm [shape: f32[1,32], index: 4, kind: input, shape index: {}]   ;;  %s844_s5 = inlined_call_operand.vmem [shape: bf16[32,32], index: 5, kind: input, shape index: {}]   ;;  %s845_s6 = inlined_call_operand.vmem [shape: f32[1,32], index: 6, kind: input, shape index: {}]   ;;  %s846_s7 = inlined_call_operand.hbm [shape: bf16[32,128], index: 7, kind: input, shape index: {}]   ;;  %s847_s8 = inlined_call_operand.vmem [shape: f32[1,128], index: 8, kind: input, shape index: {}]   ;;  %s848_s9 = inlined_call_operand.hbm [shape: f32[16,128], index: 9, kind: output, shape index: {}]  }
   0x1   :  { %15 = vsyncpa [#allocation6], 0 }
   0x2   :  { %16 = vsyncpa [#allocation9], 0 }
   0x3   :  { %17 = vsyncpa [#allocation4], 0  ;;  %s654_s30 = smov [#allocation5]   ;;  %s536_s13 = scalar_lea.hbm %s842_s3, 256 }
   0x4   :  { %s39_s10 = sshll.u32 %s654_s30, 4  ;;  %p537_p0 = scmp.ne.s32.totalorder %s842_s3, %s536_s13  ;;  %s40_s10 = int_to_ptr.vmem [resolvable:$true] %s39_s10 }
   0x5   :  { %p540_p1 = scmp.lt.u32.totalorder %s536_s13, %s842_s3 }
   0x7   :  { %p542_p2 = pnand %p540_p1, %p537_p0 }
   0x9   :  { %545 = shalt.err (!%p542_p2)
}
   0xa   :  { %s546_s18 = scalar_lea.vmem %s40_s10, 256  ;;  %p551_p4 = scmp.lt.s32.totalorder %s40_s10, %s40_s10 }
   0xb   :  { %p547_p3 = scmp.ne.s32.totalorder %s40_s10, %s546_s18  ;;  %p552_p5 = scmp.lt.s32.totalorder %s546_s18, %s546_s18 }
   0xd   :  { %p553_p6 = por %p552_p5, %p551_p4 }
   0xf   :  { %p554_p7 = pnand %p553_p6, %p547_p3 }
  0x11   :  { %557 = shalt.err (!%p554_p7)
}
  0x12   :  { %s655_s19 = smov 64   ;;  %s656_s20 = smov 4  }
  0x13   :  { %45 = dma.hbm_to_vmem [thread:$0]  %s842_s3, 256, %s40_s10, [#allocation6], %s655_s19, %s655_s19, %s656_s20  }
  0x14   :  { %s657_s23 = smov [#allocation2]   ;;  %s558_s27 = scalar_lea.hbm %s839_s0, 256 }
  0x15   :  { %s23_s24 = sshll.u32 %s657_s23, 4  ;;  %p559_p8 = scmp.ne.s32.totalorder %s839_s0, %s558_s27  ;;  %s24_s24 = int_to_ptr.vmem [resolvable:$true] %s23_s24 }
  0x16   :  { %p562_p9 = scmp.lt.u32.totalorder %s558_s27, %s839_s0 }
  0x18   :  { %p564_p10 = pnand %p562_p9, %p559_p8 }
  0x1a   :  { %567 = shalt.err (!%p564_p10)
}
  0x1b   :  { %s568_s12 = scalar_lea.vmem %s24_s24, 256  ;;  %p573_p12 = scmp.lt.s32.totalorder %s24_s24, %s24_s24 }
  0x1c   :  { %p569_p11 = scmp.ne.s32.totalorder %s24_s24, %s568_s12  ;;  %p574_p13 = scmp.lt.s32.totalorder %s568_s12, %s568_s12 }
  0x1e   :  { %p575_p0 = por %p574_p13, %p573_p12 }
  0x20   :  { %p576_p1 = pnand %p575_p0, %p569_p11 }
  0x22   :  { %579 = shalt.err (!%p576_p1)
}
  0x23   :  { %s658_s3 = smov 128   ;;  %s659_s10 = smov 8  }
  0x24   :  { %29 = dma.hbm_to_vmem [thread:$0]  %s839_s0, 256, %s24_s24, [#allocation3], %s658_s3, %s658_s3, %s659_s10  }
  0x25   :  { %s660_s15 = smov [#allocation7]   ;;  %s661_s17 = smov [#allocation8]  }
  0x26   :  { %s52_s16 = sshll.u32 %s660_s15, 4  ;;  %s65_s18 = sshll.u32 %s661_s17, 4  ;;  %s53_s16 = int_to_ptr.vmem [resolvable:$true] %s52_s16  ;;  %s745_s18 = int_to_ptr.vmem [resolvable:$true] %s65_s18 }
  0x27   :  { %s580_s23 = scalar_lea.hbm %s843_s4, 16 }
  0x28   :  { %p581_p2 = scmp.ne.s32.totalorder %s843_s4, %s580_s23  ;;  %p584_p3 = scmp.lt.u32.totalorder %s580_s23, %s843_s4 }
  0x2a   :  { %p586_p4 = pnand %p584_p3, %p581_p2 }
  0x2c   :  { %589 = shalt.err (!%p586_p4)
}
  0x2d   :  { %s590_s0 = scalar_lea.vmem %s53_s16, 16  ;;  %s594_s24 = scalar_lea.vmem %s53_s16, 32 }
  0x2e   :  { %p591_p5 = scmp.ne.s32.totalorder %s53_s16, %s590_s0  ;;  %p595_p6 = scmp.lt.s32.totalorder %s53_s16, %s53_s16 }
  0x2f   :  { %p596_p7 = scmp.lt.s32.totalorder %s594_s24, %s590_s0 }
  0x31   :  { %p597_p8 = por %p596_p7, %p595_p6 }
  0x33   :  { %p598_p9 = pnand %p597_p8, %p591_p5 }
  0x35   :  { %601 = shalt.err (!%p598_p9)
}
  0x36   :  { %55 = dma.hbm_to_vmem [thread:$0]  %s843_s4, 16, %s53_s16, [#allocation6]  }
  0x37   :  { %s602_s13 = scalar_lea.hbm %s846_s7, 256 }
  0x38   :  { %p603_p10 = scmp.ne.s32.totalorder %s846_s7, %s602_s13  ;;  %p606_p11 = scmp.lt.u32.totalorder %s602_s13, %s846_s7 }
  0x3a   :  { %p608_p12 = pnand %p606_p11, %p603_p10 }
  0x3c   :  { %611 = shalt.err (!%p608_p12)
}
  0x3d   :  { %s612_s22 = scalar_lea.vmem %s745_s18, 256  ;;  %p617_p0 = scmp.lt.s32.totalorder %s745_s18, %s745_s18 }
  0x3e   :  { %p613_p13 = scmp.ne.s32.totalorder %s745_s18, %s612_s22  ;;  %p618_p1 = scmp.lt.s32.totalorder %s612_s22, %s612_s22 }
  0x40   :  { %p619_p2 = por %p618_p1, %p617_p0 }
  0x42   :  { %p620_p3 = pnand %p619_p2, %p613_p13 }
  0x44   :  { %623 = shalt.err (!%p620_p3)
}
  0x45   :  { %71 = dma.hbm_to_vmem [thread:$0]  %s846_s7, 256, %s745_s18, [#allocation9], %s655_s19, %s655_s19, %s656_s20  }
  0x46   :  { %646 = dma.done.wait [#allocation3], 256  }
  0x47   :  { %647 = vsyncadd [#allocation3], 4294967040 }
  0x48   :  { %648 = dma.done.wait [#allocation6], 272  }
  0x49   :  { %649 = vsyncadd [#allocation6], 4294967024 }
  0x4a   :  { %650 = dma.done.wait [#allocation9], 256  }
  0x4b   :  { %651 = vsyncadd [#allocation9], 4294967040  ;;  %vm91_vm0 = vcmask 261120   ;;  %v87_v0 = vld [vmem:[#allocation2] sm:$0xff]  ;;  %v88_v1 = vld [vmem:[#allocation2 + $0x8] sm:$0xff]  ;;  %v662_v9 = vmov 0.0  }
  0x4c   :  { %v92_v2 = vsel %vm91_vm0, %v87_v0, 0.0  ;;  %v101_v3 = vmul.f32 %v87_v0, %v87_v0  ;;  %v102_v4 = vmul.f32 %v88_v1, %v88_v1  ;;  %v95_v6 = vsel %vm91_vm0, %v88_v1, 0.0  ;;  %v510_v8 = vld [vmem:[#allocation5] sm:$0xff]   ;;  %475 = vmatprep.subr.bf16.mxu0 %v662_v9  ;;  %v511_v10 = vld [vmem:[#allocation5 + $0x8] sm:$0xff]   ;;  %483 = vmatprep.subr.bf16.mxu1 %v662_v9  ;;  %v452_v30 = vld [vmem:[%s840_s1] ss:$0 sm:$0xff] }
  0x4d   :  { %93 = vadd.xlane.f32.xlu0 %v92_v2  ;;  %vm663_vm1 = vmmov 0   ;;  %476 = vmatpush3.bf16.msra.mxu0 %v510_v8  ;;  %v453_v35 = vld [vmem:[%s841_s2] ss:$0 sm:$0xff]  ;;  %s664_s28 = smov [#allocation10]  }
  0x4e   :  { %v103_v5 = vsel %vm91_vm0, %v101_v3, 0.0  ;;  %v106_v7 = vsel %vm91_vm0, %v102_v4, 0.0  ;;  %479 = vmatprep.mubr.msk.bf16.mxu0 %vm663_vm1, %v662_v9  ;;  %477 = vmatprep.subr.bf16.mxu0 %v662_v9  ;;  %v454_v40 = vld [vmem:[#allocation7] ss:$0 sm:$0xff]  ;;  %s438_s0 = sshll.u32 %s664_s28, 4  ;;  %s439_s0 = int_to_ptr.vmem [resolvable:$true] %s438_s0 }
  0x4f   :  { %104 = vadd.xlane.f32.xlu1 %v103_v5  ;;  %487 = vmatprep.mubr.msk.bf16.mxu1 %vm663_vm1, %v662_v9  ;;  %v512_v63 = vld [vmem:[%s844_s5] sm:$0xff]   ;;  %s624_s24 = scalar_lea.vmem %s439_s0, 256  ;;  %p629_p5 = scmp.lt.s32.totalorder %s439_s0, %s439_s0 }
  0x50   :  { %484 = vmatpush3.bf16.msra.mxu1 %v512_v63  ;;  %p625_p4 = scmp.ne.s32.totalorder %s439_s0, %s624_s24  ;;  %p630_p6 = scmp.lt.s32.totalorder %s624_s24, %s624_s24 }
  0x51   :  { %96 = vadd.xlane.f32.xlu0 %v95_v6  ;;  %478 = vmatpush3.bf16.msra.mxu0 %v511_v10 }
  0x52   :  { %491 = vmatprep.subr.bf16.mxu0 %v662_v9  ;;  %485 = vmatprep.subr.bf16.mxu1 %v662_v9  ;;  %p631_p7 = por %p630_p6, %p629_p5 }
  0x53   :  { %107 = vadd.xlane.f32.xlu1 %v106_v7 }
  0x54   :  { %p632_p8 = pnand %p631_p7, %p625_p4 }
  0xda   :  { %v94_v11 = vpop.xlane.xlu0 %93 }
  0xdb   :  { %v99_v12 = vmul.f32 0.03125, %v94_v11 }
  0xdc   :  { %v105_v13 = vpop.xlane.xlu1 %104 }
  0xdd   :  { %v111_v14 = vmul.f32 %v99_v12, %v99_v12  ;;  %v109_v15 = vmul.f32 0.03125, %v105_v13  ;;  %v117_v27 = vsub.f32 %v87_v0, %v99_v12  ;;  %v513_v0 = vld [vmem:[%s844_s5 + $0x8] sm:$0xff]  }
  0xde   :  { %v97_v16 = vpop.xlane.xlu0 %96  ;;  %486 = vmatpush3.bf16.msra.mxu1 %v513_v0 }
  0xdf   :  { %v113_v17 = vsub.f32 %v109_v15, %v111_v14  ;;  %v100_v18 = vmul.f32 0.03125, %v97_v16 }
  0xe0   :  { %v108_v19 = vpop.xlane.xlu1 %107 }
  0xe1   :  { %v115_v20 = vmax.f32 %v113_v17, 0.0  ;;  %v112_v21 = vmul.f32 %v100_v18, %v100_v18  ;;  %v110_v22 = vmul.f32 0.03125, %v108_v19  ;;  %v118_v31 = vsub.f32 %v88_v1, %v100_v18 }
  0xe3   :  { %v119_v23 = vadd.f32 1e-05, %v115_v20  ;;  %v114_v24 = vsub.f32 %v110_v22, %v112_v21 }
  0xe5   :  { %516 = vrsqrt.f32 %v119_v23  ;;  %v116_v25 = vmax.f32 %v114_v24, 0.0 }
  0xe7   :  { %v120_v26 = vadd.f32 1e-05, %v116_v25  ;;  %v458_v25 = vld [vmem:[%s845_s6] ss:$0 sm:$0xff] }
  0xe9   :  { %518 = vrsqrt.f32 %v120_v26 }
  0xef   :  { %v517_v28 = vpop.eup %516 }
  0xf0   :  { %v123_v29 = vmul.f32 %v517_v28, %v117_v27 }
  0xf2   :  { %v131_v34 = vmul.f32 %v452_v30, %v123_v29 }
  0xf3   :  { %v519_v32 = vpop.eup %518 }
  0xf4   :  { %v124_v33 = vmul.f32 %v519_v32, %v118_v31  ;;  %v139_v37 = vadd.f32 %v453_v35, %v131_v34 }
  0xf6   :  { %v132_v36 = vmul.f32 %v452_v30, %v124_v33 }
  0xf8   :  { %v140_v38 = vadd.f32 %v453_v35, %v132_v36 }
  0xfa   :  { %v146_v39 = vpack.c.bf16 %v140_v38, %v139_v37 }
  0xfc   :  { %480 = vmatmul.mubr.msk.bf16.vlgmr.msra.gmra.mrb[0].mxu0 %vm91_vm0, %v146_v39 }
  0xfd   :  { %495 = vmatprep.mubr.msk.bf16.mxu0 %vm663_vm1, %v662_v9 }
 0x1cf   :  { %v202_v41 = vpop.f32.mrb[0].mxu0 }
 0x1d0   :  { %v203_v42 = vadd.f32 %v454_v40, %v202_v41  ;;  %v481_v43 = vpop.f32.mrb[1].mxu0 }
 0x1d1   :  { %v205_v44 = vpop.f32.mrb[2].mxu0 }
 0x1d2   :  { %v211_v45 = vmul.f32 0.70710677, %v203_v42  ;;  %v206_v46 = vadd.f32 %v454_v40, %v205_v44  ;;  %v482_v47 = vpop.f32.mrb[3].mxu0  ;;  %v209_v50 = vmul.f32 0.5, %v203_v42 }
 0x1d4   :  { %520 = verf.f32 %v211_v45  ;;  %v212_v48 = vmul.f32 0.70710677, %v206_v46  ;;  %v210_v54 = vmul.f32 0.5, %v206_v46 }
 0x1d6   :  { %522 = verf.f32 %v212_v48  ;;  %v514_v48 = vld [vmem:[#allocation8] sm:$0xff]  }
 0x1d7   :  { %492 = vmatpush3.bf16.msra.mxu0 %v514_v48 }
 0x1d8   :  { %493 = vmatprep.subr.bf16.mxu0 %v662_v9 }
 0x1de   :  { %v521_v49 = vpop.eup %520 }
 0x1df   :  { %v215_v51 = vadd.f32 1.0, %v521_v49  ;;  %v515_v49 = vld [vmem:[#allocation8 + $0x8] sm:$0xff]  }
 0x1e0   :  { %v523_v52 = vpop.eup %522  ;;  %494 = vmatpush3.bf16.msra.mxu0 %v515_v49 }
 0x1e1   :  { %v217_v53 = vmul.f32 %v215_v51, %v209_v50  ;;  %v216_v55 = vadd.f32 1.0, %v523_v52 }
 0x1e3   :  { %v218_v56 = vmul.f32 %v216_v55, %v210_v54  ;;  %v219_v57 = vsel %vm91_vm0, %v217_v53, 0.0  ;;  %v227_v58 = vmul.f32 %v217_v53, %v217_v53 }
 0x1e4   :  { %220 = vadd.xlane.f32.xlu0 %v219_v57 }
 0x1e5   :  { %v222_v59 = vsel %vm91_vm0, %v218_v56, 0.0  ;;  %v228_v60 = vmul.f32 %v218_v56, %v218_v56  ;;  %v229_v61 = vsel %vm91_vm0, %v227_v58, 0.0 }
 0x1e6   :  { %223 = vadd.xlane.f32.xlu1 %v222_v59 }
 0x1e7   :  { %v232_v62 = vsel %vm91_vm0, %v228_v60, 0.0 }
 0x1e8   :  { %230 = vadd.xlane.f32.xlu0 %v229_v61 }
 0x1ea   :  { %233 = vadd.xlane.f32.xlu1 %v232_v62 }
 0x271   :  { %v221_v1 = vpop.xlane.xlu0 %220 }
 0x272   :  { %v225_v2 = vmul.f32 0.03125, %v221_v1 }
 0x273   :  { %v224_v3 = vpop.xlane.xlu1 %223 }
 0x274   :  { %v226_v4 = vmul.f32 0.03125, %v224_v3  ;;  %v237_v6 = vmul.f32 %v225_v2, %v225_v2  ;;  %v243_v19 = vsub.f32 %v217_v53, %v225_v2 }
 0x275   :  { %v231_v5 = vpop.xlane.xlu0 %230 }
 0x276   :  { %v235_v7 = vmul.f32 0.03125, %v231_v5  ;;  %v238_v10 = vmul.f32 %v226_v4, %v226_v4  ;;  %v244_v20 = vsub.f32 %v218_v56, %v226_v4 }
 0x277   :  { %v234_v8 = vpop.xlane.xlu1 %233 }
 0x278   :  { %v239_v11 = vsub.f32 %v235_v7, %v237_v6  ;;  %v236_v12 = vmul.f32 0.03125, %v234_v8 }
 0x27a   :  { %v241_v13 = vmax.f32 %v239_v11, 0.0  ;;  %v240_v14 = vsub.f32 %v236_v12, %v238_v10  ;;  %v462_v11 = vld [vmem:[%s847_s8] ss:$0 sm:$0xff] }
 0x27c   :  { %v245_v15 = vadd.f32 1e-05, %v241_v13  ;;  %v242_v16 = vmax.f32 %v240_v14, 0.0 }
 0x27e   :  { %524 = vrsqrt.f32 %v245_v15  ;;  %v246_v17 = vadd.f32 1e-05, %v242_v16 }
 0x280   :  { %526 = vrsqrt.f32 %v246_v17 }
 0x288   :  { %v525_v18 = vpop.eup %524 }
 0x289   :  { %v249_v22 = vmul.f32 %v525_v18, %v243_v19 }
 0x28a   :  { %v527_v21 = vpop.eup %526 }
 0x28b   :  { %v250_v23 = vmul.f32 %v527_v21, %v244_v20 }
 0x28d   :  { %v256_v24 = vpack.c.bf16 %v250_v23, %v249_v22 }
 0x28f   :  { %488 = vmatmul.mubr.msk.bf16.vlgmr.msra.gmra.mrb[0].mxu1 %vm91_vm0, %v256_v24 }
 0x362   :  { %v312_v26 = vpop.f32.mrb[0].mxu1 }
 0x363   :  { %v313_v27 = vadd.f32 %v458_v25, %v312_v26  ;;  %v489_v28 = vpop.f32.mrb[1].mxu1 }
 0x364   :  { %v315_v29 = vpop.f32.mrb[2].mxu1 }
 0x365   :  { %v321_v30 = vmul.f32 0.70710677, %v313_v27  ;;  %v316_v31 = vadd.f32 %v458_v25, %v315_v29  ;;  %v490_v32 = vpop.f32.mrb[3].mxu1  ;;  %v319_v35 = vmul.f32 0.5, %v313_v27 }
 0x367   :  { %528 = verf.f32 %v321_v30  ;;  %v322_v33 = vmul.f32 0.70710677, %v316_v31  ;;  %v320_v39 = vmul.f32 0.5, %v316_v31 }
 0x369   :  { %530 = verf.f32 %v322_v33 }
 0x371   :  { %v529_v34 = vpop.eup %528 }
 0x372   :  { %v325_v36 = vadd.f32 1.0, %v529_v34 }
 0x373   :  { %v531_v37 = vpop.eup %530 }
 0x374   :  { %v327_v38 = vmul.f32 %v325_v36, %v319_v35  ;;  %v326_v40 = vadd.f32 1.0, %v531_v37 }
 0x376   :  { %v328_v41 = vmul.f32 %v326_v40, %v320_v39  ;;  %v329_v42 = vsel %vm91_vm0, %v327_v38, 0.0  ;;  %v337_v43 = vmul.f32 %v327_v38, %v327_v38 }
 0x377   :  { %330 = vadd.xlane.f32.xlu0 %v329_v42 }
 0x378   :  { %v332_v44 = vsel %vm91_vm0, %v328_v41, 0.0  ;;  %v338_v45 = vmul.f32 %v328_v41, %v328_v41  ;;  %v339_v46 = vsel %vm91_vm0, %v337_v43, 0.0 }
 0x379   :  { %333 = vadd.xlane.f32.xlu1 %v332_v44 }
 0x37a   :  { %v342_v47 = vsel %vm91_vm0, %v338_v45, 0.0 }
 0x37b   :  { %340 = vadd.xlane.f32.xlu0 %v339_v46 }
 0x37d   :  { %343 = vadd.xlane.f32.xlu1 %v342_v47 }
 0x404   :  { %v331_v50 = vpop.xlane.xlu0 %330 }
 0x405   :  { %v335_v51 = vmul.f32 0.03125, %v331_v50 }
 0x406   :  { %v334_v52 = vpop.xlane.xlu1 %333 }
 0x407   :  { %v336_v53 = vmul.f32 0.03125, %v334_v52  ;;  %v347_v55 = vmul.f32 %v335_v51, %v335_v51  ;;  %v353_v9 = vsub.f32 %v327_v38, %v335_v51 }
 0x408   :  { %v341_v54 = vpop.xlane.xlu0 %340 }
 0x409   :  { %v345_v56 = vmul.f32 0.03125, %v341_v54  ;;  %v348_v58 = vmul.f32 %v336_v53, %v336_v53  ;;  %v354_v3 = vsub.f32 %v328_v41, %v336_v53 }
 0x40a   :  { %v344_v57 = vpop.xlane.xlu1 %343 }
 0x40b   :  { %v349_v59 = vsub.f32 %v345_v56, %v347_v55  ;;  %v346_v60 = vmul.f32 0.03125, %v344_v57 }
 0x40d   :  { %v351_v61 = vmax.f32 %v349_v59, 0.0  ;;  %v350_v62 = vsub.f32 %v346_v60, %v348_v58 }
 0x40f   :  { %v355_v63 = vadd.f32 1e-05, %v351_v61  ;;  %v352_v0 = vmax.f32 %v350_v62, 0.0 }
 0x411   :  { %532 = vrsqrt.f32 %v355_v63  ;;  %v356_v1 = vadd.f32 1e-05, %v352_v0 }
 0x413   :  { %534 = vrsqrt.f32 %v356_v1 }
 0x41b   :  { %v533_v2 = vpop.eup %532 }
 0x41c   :  { %v359_v4 = vmul.f32 %v533_v2, %v353_v9 }
 0x41d   :  { %v535_v5 = vpop.eup %534 }
 0x41e   :  { %v360_v6 = vmul.f32 %v535_v5, %v354_v3  ;;  %v361_v7 = vadd.f32 %v359_v4, %v249_v22 }
 0x420   :  { %v362_v8 = vadd.f32 %v360_v6, %v250_v23 }
 0x422   :  { %v368_v10 = vpack.c.bf16 %v362_v8, %v361_v7 }
 0x424   :  { %496 = vmatmul.mubr.msk.bf16.vlgmr.msra.gmra.mrb[4].mxu0 %vm91_vm0, %v368_v10 }
 0x4f7   :  { %v424_v12 = vpop.f32.mrb[4].mxu0 }
 0x4f8   :  { %v425_v13 = vadd.f32 %v462_v11, %v424_v12  ;;  %v497_v14 = vpop.f32.mrb[5].mxu0 }
 0x4f9   :  { %v427_v15 = vpop.f32.mrb[6].mxu0 }
 0x4fa   :  { %431 = vst [vmem:[#allocation10] sm:$0xff] %v425_v13  ;;  %v428_v16 = vadd.f32 %v462_v11, %v427_v15  ;;  %v498_v17 = vpop.f32.mrb[7].mxu0 }
 0x4fc   :  { %432 = vst [vmem:[#allocation10 + $0x8] sm:$0xff] %v428_v16 }
 0x4fd   :  { %635 = shalt.err (!%p632_p8)
}
 0x4fe   :  { %s636_s30 = scalar_lea.hbm %s848_s9, 256 }
 0x4ff   :  { %p637_p9 = scmp.ne.s32.totalorder %s848_s9, %s636_s30  ;;  %p640_p10 = scmp.lt.u32.totalorder %s636_s30, %s848_s9 }
 0x501   :  { %p642_p11 = pnand %p640_p10, %p637_p9 }
 0x503   :  { %645 = shalt.err (!%p642_p11)
}
 0x504   :  { %444 = dma.vmem_to_hbm [thread:$0]  %s439_s0, 256, %s848_s9, [#allocation4], %s658_s3, %s658_s3, %s659_s10  }
 0x505   :  { %652 = dma.done.wait [#allocation4], 256  }
 0x506   :  { %653 = vsyncadd [#allocation4], 4294967040 }
 0x507   :  { %448 = vsyncpa [#allocation3], 1 }
 0x508   :  { %449 = vsyncpa [#allocation6], 1 }
 0x509   :  { %450 = vsyncpa [#allocation9], 1 }
 0x50a   :  { %451 = vsyncpa [#allocation4], 1 }

// kernel: tpu_custom_call.1
= control target key start
LH: loop header
LB: loop body
LE: loop exit
PB: predicated region body
PF: predicated region fallthrough
CT: control target
= control target key end

     0   :  { %14 = vsyncpa [#allocation3], 0  ;;  %s839_s0 = inlined_call_operand.hbm [shape: f32[16,32], index: 0, kind: input, shape index: {}]   ;;  %s840_s1 = inlined_call_operand.vmem [shape: f32[1,32], index: 1, kind: input, shape index: {}]   ;;  %s841_s2 = inlined_call_operand.vmem [shape: f32[1,32], index: 2, kind: input, shape index: {}]   ;;  %s842_s3 = inlined_call_operand.hbm [shape: bf16[32,32], index: 3, kind: input, shape index: {}]   ;;  %s843_s4 = inlined_call_operand.hbm [shape: f32[1,32], index: 4, kind: input, shape index: {}]   ;;  %s844_s5 = inlined_call_operand.vmem [shape: bf16[32,32], index: 5, kind: input, shape index: {}]   ;;  %s845_s6 = inlined_call_operand.vmem [shape: f32[1,32], index: 6, kind: input, shape index: {}]   ;;  %s846_s7 = inlined_call_operand.hbm [shape: bf16[32,128], index: 7, kind: input, shape index: {}]   ;;  %s847_s8 = inlined_call_operand.vmem [shape: f32[1,128], index: 8, kind: input, shape index: {}]   ;;  %s848_s9 = inlined_call_operand.hbm [shape: f32[16,128], index: 9, kind: output, shape index: {}]  }
   0x1   :  { %15 = vsyncpa [#allocation6], 0 }
   0x2   :  { %16 = vsyncpa [#allocation9], 0 }
   0x3   :  { %17 = vsyncpa [#allocation4], 0  ;;  %s654_s30 = smov [#allocation5]   ;;  %s536_s13 = scalar_lea.hbm %s842_s3, 256 }
   0x4   :  { %s39_s10 = sshll.u32 %s654_s30, 4  ;;  %p537_p0 = scmp.ne.s32.totalorder %s842_s3, %s536_s13  ;;  %s40_s10 = int_to_ptr.vmem [resolvable:$true] %s39_s10 }
   0x5   :  { %p540_p1 = scmp.lt.u32.totalorder %s536_s13, %s842_s3 }
   0x7   :  { %p542_p2 = pnand %p540_p1, %p537_p0 }
   0x9   :  { %545 = shalt.err (!%p542_p2)
}
   0xa   :  { %s546_s18 = scalar_lea.vmem %s40_s10, 256  ;;  %p551_p4 = scmp.lt.s32.totalorder %s40_s10, %s40_s10 }
   0xb   :  { %p547_p3 = scmp.ne.s32.totalorder %s40_s10, %s546_s18  ;;  %p552_p5 = scmp.lt.s32.totalorder %s546_s18, %s546_s18 }
   0xd   :  { %p553_p6 = por %p552_p5, %p551_p4 }
   0xf   :  { %p554_p7 = pnand %p553_p6, %p547_p3 }
  0x11   :  { %557 = shalt.err (!%p554_p7)
}
  0x12   :  { %s655_s19 = smov 64   ;;  %s656_s20 = smov 4  }
  0x13   :  { %45 = dma.hbm_to_vmem [thread:$0]  %s842_s3, 256, %s40_s10, [#allocation6], %s655_s19, %s655_s19, %s656_s20  }
  0x14   :  { %s657_s23 = smov [#allocation2]   ;;  %s558_s27 = scalar_lea.hbm %s839_s0, 256 }
  0x15   :  { %s23_s24 = sshll.u32 %s657_s23, 4  ;;  %p559_p8 = scmp.ne.s32.totalorder %s839_s0, %s558_s27  ;;  %s24_s24 = int_to_ptr.vmem [resolvable:$true] %s23_s24 }
  0x16   :  { %p562_p9 = scmp.lt.u32.totalorder %s558_s27, %s839_s0 }
  0x18   :  { %p564_p10 = pnand %p562_p9, %p559_p8 }
  0x1a   :  { %567 = shalt.err (!%p564_p10)
}
  0x1b   :  { %s568_s12 = scalar_lea.vmem %s24_s24, 256  ;;  %p573_p12 = scmp.lt.s32.totalorder %s24_s24, %s24_s24 }
  0x1c   :  { %p569_p11 = scmp.ne.s32.totalorder %s24_s24, %s568_s12  ;;  %p574_p13 = scmp.lt.s32.totalorder %s568_s12, %s568_s12 }
  0x1e   :  { %p575_p0 = por %p574_p13, %p573_p12 }
  0x20   :  { %p576_p1 = pnand %p575_p0, %p569_p11 }
  0x22   :  { %579 = shalt.err (!%p576_p1)
}
  0x23   :  { %s658_s3 = smov 128   ;;  %s659_s10 = smov 8  }
  0x24   :  { %29 = dma.hbm_to_vmem [thread:$0]  %s839_s0, 256, %s24_s24, [#allocation3], %s658_s3, %s658_s3, %s659_s10  }
  0x25   :  { %s660_s15 = smov [#allocation7]   ;;  %s661_s17 = smov [#allocation8]  }
  0x26   :  { %s52_s16 = sshll.u32 %s660_s15, 4  ;;  %s65_s18 = sshll.u32 %s661_s17, 4  ;;  %s53_s16 = int_to_ptr.vmem [resolvable:$true] %s52_s16  ;;  %s745_s18 = int_to_ptr.vmem [resolvable:$true] %s65_s18 }
  0x27   :  { %s580_s23 = scalar_lea.hbm %s843_s4, 16 }
  0x28   :  { %p581_p2 = scmp.ne.s32.totalorder %s843_s4, %s580_s23  ;;  %p584_p3 = scmp.lt.u32.totalorder %s580_s23, %s843_s4 }
  0x2a   :  { %p586_p4 = pnand %p584_p3, %p581_p2 }
  0x2c   :  { %589 = shalt.err (!%p586_p4)
}
  0x2d   :  { %s590_s0 = scalar_lea.vmem %s53_s16, 16  ;;  %s594_s24 = scalar_lea.vmem %s53_s16, 32 }
  0x2e   :  { %p591_p5 = scmp.ne.s32.totalorder %s53_s16, %s590_s0  ;;  %p595_p6 = scmp.lt.s32.totalorder %s53_s16, %s53_s16 }
  0x2f   :  { %p596_p7 = scmp.lt.s32.totalorder %s594_s24, %s590_s0 }
  0x31   :  { %p597_p8 = por %p596_p7, %p595_p6 }
  0x33   :  { %p598_p9 = pnand %p597_p8, %p591_p5 }
  0x35   :  { %601 = shalt.err (!%p598_p9)
}
  0x36   :  { %55 = dma.hbm_to_vmem [thread:$0]  %s843_s4, 16, %s53_s16, [#allocation6]  }
  0x37   :  { %s602_s13 = scalar_lea.hbm %s846_s7, 256 }
  0x38   :  { %p603_p10 = scmp.ne.s32.totalorder %s846_s7, %s602_s13  ;;  %p606_p11 = scmp.lt.u32.totalorder %s602_s13, %s846_s7 }
  0x3a   :  { %p608_p12 = pnand %p606_p11, %p603_p10 }
  0x3c   :  { %611 = shalt.err (!%p608_p12)
}
  0x3d   :  { %s612_s22 = scalar_lea.vmem %s745_s18, 256  ;;  %p617_p0 = scmp.lt.s32.totalorder %s745_s18, %s745_s18 }
  0x3e   :  { %p613_p13 = scmp.ne.s32.totalorder %s745_s18, %s612_s22  ;;  %p618_p1 = scmp.lt.s32.totalorder %s612_s22, %s612_s22 }
  0x40   :  { %p619_p2 = por %p618_p1, %p617_p0 }
  0x42   :  { %p620_p3 = pnand %p619_p2, %p613_p13 }
  0x44   :  { %623 = shalt.err (!%p620_p3)
}
  0x45   :  { %71 = dma.hbm_to_vmem [thread:$0]  %s846_s7, 256, %s745_s18, [#allocation9], %s655_s19, %s655_s19, %s656_s20  }
  0x46   :  { %646 = dma.done.wait [#allocation3], 256  }
  0x47   :  { %647 = vsyncadd [#allocation3], 4294967040 }
  0x48   :  { %648 = dma.done.wait [#allocation6], 272  }
  0x49   :  { %649 = vsyncadd [#allocation6], 4294967024 }
  0x4a   :  { %650 = dma.done.wait [#allocation9], 256  }
  0x4b   :  { %651 = vsyncadd [#allocation9], 4294967040  ;;  %vm91_vm0 = vcmask 261120   ;;  %v87_v0 = vld [vmem:[#allocation2] sm:$0xff]  ;;  %v88_v1 = vld [vmem:[#allocation2 + $0x8] sm:$0xff]  ;;  %v662_v9 = vmov 0.0  }
  0x4c   :  { %v92_v2 = vsel %vm91_vm0, %v87_v0, 0.0  ;;  %v101_v3 = vmul.f32 %v87_v0, %v87_v0  ;;  %v102_v4 = vmul.f32 %v88_v1, %v88_v1  ;;  %v95_v6 = vsel %vm91_vm0, %v88_v1, 0.0  ;;  %v510_v8 = vld [vmem:[#allocation5] sm:$0xff]   ;;  %475 = vmatprep.subr.bf16.mxu0 %v662_v9  ;;  %v511_v10 = vld [vmem:[#allocation5 + $0x8] sm:$0xff]   ;;  %483 = vmatprep.subr.bf16.mxu1 %v662_v9  ;;  %v452_v30 = vld [vmem:[%s840_s1] ss:$0 sm:$0xff] }
  0x4d   :  { %93 = vadd.xlane.f32.xlu0 %v92_v2  ;;  %vm663_vm1 = vmmov 0   ;;  %476 = vmatpush3.bf16.msra.mxu0 %v510_v8  ;;  %v453_v35 = vld [vmem:[%s841_s2] ss:$0 sm:$0xff]  ;;  %s664_s28 = smov [#allocation10]  }
  0x4e   :  { %v103_v5 = vsel %vm91_vm0, %v101_v3, 0.0  ;;  %v106_v7 = vsel %vm91_vm0, %v102_v4, 0.0  ;;  %479 = vmatprep.mubr.msk.bf16.mxu0 %vm663_vm1, %v662_v9  ;;  %477 = vmatprep.subr.bf16.mxu0 %v662_v9  ;;  %v454_v40 = vld [vmem:[#allocation7] ss:$0 sm:$0xff]  ;;  %s438_s0 = sshll.u32 %s664_s28, 4  ;;  %s439_s0 = int_to_ptr.vmem [resolvable:$true] %s438_s0 }
  0x4f   :  { %104 = vadd.xlane.f32.xlu1 %v103_v5  ;;  %487 = vmatprep.mubr.msk.bf16.mxu1 %vm663_vm1, %v662_v9  ;;  %v512_v63 = vld [vmem:[%s844_s5] sm:$0xff]   ;;  %s624_s24 = scalar_lea.vmem %s439_s0, 256  ;;  %p629_p5 = scmp.lt.s32.totalorder %s439_s0, %s439_s0 }
  0x50   :  { %484 = vmatpush3.bf16.msra.mxu1 %v512_v63  ;;  %p625_p4 = scmp.ne.s32.totalorder %s439_s0, %s624_s24  ;;  %p630_p6 = scmp.lt.s32.totalorder %s624_s24, %s624_s24 }
  0x51   :  { %96 = vadd.xlane.f32.xlu0 %v95_v6  ;;  %478 = vmatpush3.bf16.msra.mxu0 %v511_v10 }
  0x52   :  { %491 = vmatprep.subr.bf16.mxu0 %v662_v9  ;;  %485 = vmatprep.subr.bf16.mxu1 %v662_v9  ;;  %p631_p7 = por %p630_p6, %p629_p5 }
  0x53   :  { %107 = vadd.xlane.f32.xlu1 %v106_v7 }
  0x54   :  { %p632_p8 = pnand %p631_p7, %p625_p4 }
  0xda   :  { %v94_v11 = vpop.xlane.xlu0 %93 }
  0xdb   :  { %v99_v12 = vmul.f32 0.03125, %v94_v11 }
  0xdc   :  { %v105_v13 = vpop.xlane.xlu1 %104 }
  0xdd   :  { %v111_v14 = vmul.f32 %v99_v12, %v99_v12  ;;  %v109_v15 = vmul.f32 0.03125, %v105_v13  ;;  %v117_v27 = vsub.f32 %v87_v0, %v99_v12  ;;  %v513_v0 = vld [vmem:[%s844_s5 + $0x8] sm:$0xff]  }
  0xde   :  { %v97_v16 = vpop.xlane.xlu0 %96  ;;  %486 = vmatpush3.bf16.msra.mxu1 %v513_v0 }
  0xdf   :  { %v113_v17 = vsub.f32 %v109_v15, %v111_v14  ;;  %v100_v18 = vmul.f32 0.03125, %v97_v16 }
  0xe0   :  { %v108_v19 = vpop.xlane.xlu1 %107 }
  0xe1   :  { %v115_v20 = vmax.f32 %v113_v17, 0.0  ;;  %v112_v21 = vmul.f32 %v100_v18, %v100_v18  ;;  %v110_v22 = vmul.f32 0.03125, %v108_v19  ;;  %v118_v31 = vsub.f32 %v88_v1, %v100_v18 }
  0xe3   :  { %v119_v23 = vadd.f32 1e-05, %v115_v20  ;;  %v114_v24 = vsub.f32 %v110_v22, %v112_v21 }
  0xe5   :  { %516 = vrsqrt.f32 %v119_v23  ;;  %v116_v25 = vmax.f32 %v114_v24, 0.0 }
  0xe7   :  { %v120_v26 = vadd.f32 1e-05, %v116_v25  ;;  %v458_v25 = vld [vmem:[%s845_s6] ss:$0 sm:$0xff] }
  0xe9   :  { %518 = vrsqrt.f32 %v120_v26 }
  0xef   :  { %v517_v28 = vpop.eup %516 }
  0xf0   :  { %v123_v29 = vmul.f32 %v517_v28, %v117_v27 }
  0xf2   :  { %v131_v34 = vmul.f32 %v452_v30, %v123_v29 }
  0xf3   :  { %v519_v32 = vpop.eup %518 }
  0xf4   :  { %v124_v33 = vmul.f32 %v519_v32, %v118_v31  ;;  %v139_v37 = vadd.f32 %v453_v35, %v131_v34 }
  0xf6   :  { %v132_v36 = vmul.f32 %v452_v30, %v124_v33 }
  0xf8   :  { %v140_v38 = vadd.f32 %v453_v35, %v132_v36 }
  0xfa   :  { %v146_v39 = vpack.c.bf16 %v140_v38, %v139_v37 }
  0xfc   :  { %480 = vmatmul.mubr.msk.bf16.vlgmr.msra.gmra.mrb[0].mxu0 %vm91_vm0, %v146_v39 }
  0xfd   :  { %495 = vmatprep.mubr.msk.bf16.mxu0 %vm663_vm1, %v662_v9 }
 0x1cf   :  { %v202_v41 = vpop.f32.mrb[0].mxu0 }
 0x1d0   :  { %v203_v42 = vadd.f32 %v454_v40, %v202_v41  ;;  %v481_v43 = vpop.f32.mrb[1].mxu0 }
 0x1d1   :  { %v205_v44 = vpop.f32.mrb[2].mxu0 }
 0x1d2   :  { %v211_v45 = vmul.f32 0.70710677, %v203_v42  ;;  %v206_v46 = vadd.f32 %v454_v40, %v205_v44  ;;  %v482_v47 = vpop.f32.mrb[3].mxu0  ;;  %v209_v50 = vmul.f32 0.5, %v203_v42 }
 0x1d4   :  { %520 = verf.f32 %v211_v45  ;;  %v212_v48 = vmul.f32 0.70710677, %v206_v46  ;;  %v210_v54 = vmul.f32 0.5, %v206_v46 }
 0x1d6   :  { %522 = verf.f32 %v212_v48  ;;  %v514_v48 = vld [vmem:[#allocation8] sm:$0xff]  }
 0x1d7   :  { %492 = vmatpush3.bf16.msra.mxu0 %v514_v48 }
 0x1d8   :  { %493 = vmatprep.subr.bf16.mxu0 %v662_v9 }
 0x1de   :  { %v521_v49 = vpop.eup %520 }
 0x1df   :  { %v215_v51 = vadd.f32 1.0, %v521_v49  ;;  %v515_v49 = vld [vmem:[#allocation8 + $0x8] sm:$0xff]  }
 0x1e0   :  { %v523_v52 = vpop.eup %522  ;;  %494 = vmatpush3.bf16.msra.mxu0 %v515_v49 }
 0x1e1   :  { %v217_v53 = vmul.f32 %v215_v51, %v209_v50  ;;  %v216_v55 = vadd.f32 1.0, %v523_v52 }
 0x1e3   :  { %v218_v56 = vmul.f32 %v216_v55, %v210_v54  ;;  %v219_v57 = vsel %vm91_vm0, %v217_v53, 0.0  ;;  %v227_v58 = vmul.f32 %v217_v53, %v217_v53 }
 0x1e4   :  { %220 = vadd.xlane.f32.xlu0 %v219_v57 }
 0x1e5   :  { %v222_v59 = vsel %vm91_vm0, %v218_v56, 0.0  ;;  %v228_v60 = vmul.f32 %v218_v56, %v218_v56  ;;  %v229_v61 = vsel %vm91_vm0, %v227_v58, 0.0 }
 0x1e6   :  { %223 = vadd.xlane.f32.xlu1 %v222_v59 }
 0x1e7   :  { %v232_v62 = vsel %vm91_vm0, %v228_v60, 0.0 }
 0x1e8   :  { %230 = vadd.xlane.f32.xlu0 %v229_v61 }
 0x1ea   :  { %233 = vadd.xlane.f32.xlu1 %v232_v62 }
 0x271   :  { %v221_v1 = vpop.xlane.xlu0 %220 }
 0x272   :  { %v225_v2 = vmul.f32 0.03125, %v221_v1 }
 0x273   :  { %v224_v3 = vpop.xlane.xlu1 %223 }
 0x274   :  { %v226_v4 = vmul.f32 0.03125, %v224_v3  ;;  %v237_v6 = vmul.f32 %v225_v2, %v225_v2  ;;  %v243_v19 = vsub.f32 %v217_v53, %v225_v2 }
 0x275   :  { %v231_v5 = vpop.xlane.xlu0 %230 }
 0x276   :  { %v235_v7 = vmul.f32 0.03125, %v231_v5  ;;  %v238_v10 = vmul.f32 %v226_v4, %v226_v4  ;;  %v244_v20 = vsub.f32 %v218_v56, %v226_v4 }
 0x277   :  { %v234_v8 = vpop.xlane.xlu1 %233 }
 0x278   :  { %v239_v11 = vsub.f32 %v235_v7, %v237_v6  ;;  %v236_v12 = vmul.f32 0.03125, %v234_v8 }
 0x27a   :  { %v241_v13 = vmax.f32 %v239_v11, 0.0  ;;  %v240_v14 = vsub.f32 %v236_v12, %v238_v10  ;;  %v462_v11 = vld [vmem:[%s847_s8] ss:$0 sm:$0xff] }
 0x27c   :  { %v245_v15 = vadd.f32 1e-05, %v241_v13  ;;  %v242_v16 = vmax.f32 %v240_v14, 0.0 }
 0x27e   :  { %524 = vrsqrt.f32 %v245_v15  ;;  %v246_v17 = vadd.f32 1e-05, %v242_v16 }
 0x280   :  { %526 = vrsqrt.f32 %v246_v17 }
 0x288   :  { %v525_v18 = vpop.eup %524 }
 0x289   :  { %v249_v22 = vmul.f32 %v525_v18, %v243_v19 }
 0x28a   :  { %v527_v21 = vpop.eup %526 }
 0x28b   :  { %v250_v23 = vmul.f32 %v527_v21, %v244_v20 }
 0x28d   :  { %v256_v24 = vpack.c.bf16 %v250_v23, %v249_v22 }
 0x28f   :  { %488 = vmatmul.mubr.msk.bf16.vlgmr.msra.gmra.mrb[0].mxu1 %vm91_vm0, %v256_v24 }
 0x362   :  { %v312_v26 = vpop.f32.mrb[0].mxu1 }
 0x363   :  { %v313_v27 = vadd.f32 %v458_v25, %v312_v26  ;;  %v489_v28 = vpop.f32.mrb[1].mxu1 }
 0x364   :  { %v315_v29 = vpop.f32.mrb[2].mxu1 }
 0x365   :  { %v321_v30 = vmul.f32 0.70710677, %v313_v27  ;;  %v316_v31 = vadd.f32 %v458_v25, %v315_v29  ;;  %v490_v32 = vpop.f32.mrb[3].mxu1  ;;  %v319_v35 = vmul.f32 0.5, %v313_v27 }
 0x367   :  { %528 = verf.f32 %v321_v30  ;;  %v322_v33 = vmul.f32 0.70710677, %v316_v31  ;;  %v320_v39 = vmul.f32 0.5, %v316_v31 }
 0x369   :  { %530 = verf.f32 %v322_v33 }
 0x371   :  { %v529_v34 = vpop.eup %528 }
 0x372   :  { %v325_v36 = vadd.f32 1.0, %v529_v34 }
 0x373   :  { %v531_v37 = vpop.eup %530 }
 0x374   :  { %v327_v38 = vmul.f32 %v325_v36, %v319_v35  ;;  %v326_v40 = vadd.f32 1.0, %v531_v37 }
 0x376   :  { %v328_v41 = vmul.f32 %v326_v40, %v320_v39  ;;  %v329_v42 = vsel %vm91_vm0, %v327_v38, 0.0  ;;  %v337_v43 = vmul.f32 %v327_v38, %v327_v38 }
 0x377   :  { %330 = vadd.xlane.f32.xlu0 %v329_v42 }
 0x378   :  { %v332_v44 = vsel %vm91_vm0, %v328_v41, 0.0  ;;  %v338_v45 = vmul.f32 %v328_v41, %v328_v41  ;;  %v339_v46 = vsel %vm91_vm0, %v337_v43, 0.0 }
 0x379   :  { %333 = vadd.xlane.f32.xlu1 %v332_v44 }
 0x37a   :  { %v342_v47 = vsel %vm91_vm0, %v338_v45, 0.0 }
 0x37b   :  { %340 = vadd.xlane.f32.xlu0 %v339_v46 }
 0x37d   :  { %343 = vadd.xlane.f32.xlu1 %v342_v47 }
 0x404   :  { %v331_v50 = vpop.xlane.xlu0 %330 }
 0x405   :  { %v335_v51 = vmul.f32 0.03125, %v331_v50 }
 0x406   :  { %v334_v52 = vpop.xlane.xlu1 %333 }
 0x407   :  { %v336_v53 = vmul.f32 0.03125, %v334_v52  ;;  %v347_v55 = vmul.f32 %v335_v51, %v335_v51  ;;  %v353_v9 = vsub.f32 %v327_v38, %v335_v51 }
 0x408   :  { %v341_v54 = vpop.xlane.xlu0 %340 }
 0x409   :  { %v345_v56 = vmul.f32 0.03125, %v341_v54  ;;  %v348_v58 = vmul.f32 %v336_v53, %v336_v53  ;;  %v354_v3 = vsub.f32 %v328_v41, %v336_v53 }
 0x40a   :  { %v344_v57 = vpop.xlane.xlu1 %343 }
 0x40b   :  { %v349_v59 = vsub.f32 %v345_v56, %v347_v55  ;;  %v346_v60 = vmul.f32 0.03125, %v344_v57 }
 0x40d   :  { %v351_v61 = vmax.f32 %v349_v59, 0.0  ;;  %v350_v62 = vsub.f32 %v346_v60, %v348_v58 }
 0x40f   :  { %v355_v63 = vadd.f32 1e-05, %v351_v61  ;;  %v352_v0 = vmax.f32 %v350_v62, 0.0 }
 0x411   :  { %532 = vrsqrt.f32 %v355_v63  ;;  %v356_v1 = vadd.f32 1e-05, %v352_v0 }
 0x413   :  { %534 = vrsqrt.f32 %v356_v1 }
 0x41b   :  { %v533_v2 = vpop.eup %532 }
 0x41c   :  { %v359_v4 = vmul.f32 %v533_v2, %v353_v9 }
 0x41d   :  { %v535_v5 = vpop.eup %534 }
 0x41e   :  { %v360_v6 = vmul.f32 %v535_v5, %v354_v3  ;;  %v361_v7 = vadd.f32 %v359_v4, %v249_v22 }
 0x420   :  { %v362_v8 = vadd.f32 %v360_v6, %v250_v23 }
 0x422   :  { %v368_v10 = vpack.c.bf16 %v362_v8, %v361_v7 }
 0x424   :  { %496 = vmatmul.mubr.msk.bf16.vlgmr.msra.gmra.mrb[4].mxu0 %vm91_vm0, %v368_v10 }
 0x4f7   :  { %v424_v12 = vpop.f32.mrb[4].mxu0 }
 0x4f8   :  { %v425_v13 = vadd.f32 %v462_v11, %v424_v12  ;;  %v497_v14 = vpop.f32.mrb[5].mxu0 }
 0x4f9   :  { %v427_v15 = vpop.f32.mrb[6].mxu0 }
 0x4fa   :  { %431 = vst [vmem:[#allocation10] sm:$0xff] %v425_v13  ;;  %v428_v16 = vadd.f32 %v462_v11, %v427_v15  ;;  %v498_v17 = vpop.f32.mrb[7].mxu0 }
 0x4fc   :  { %432 = vst [vmem:[#allocation10 + $0x8] sm:$0xff] %v428_v16 }
 0x4fd   :  { %635 = shalt.err (!%p632_p8)
}
 0x4fe   :  { %s636_s30 = scalar_lea.hbm %s848_s9, 256 }
 0x4ff   :  { %p637_p9 = scmp.ne.s32.totalorder %s848_s9, %s636_s30  ;;  %p640_p10 = scmp.lt.u32.totalorder %s636_s30, %s848_s9 }
 0x501   :  { %p642_p11 = pnand %p640_p10, %p637_p9 }
 0x503   :  { %645 = shalt.err (!%p642_p11)
}
 0x504   :  { %444 = dma.vmem_to_hbm [thread:$0]  %s439_s0, 256, %s848_s9, [#allocation4], %s658_s3, %s658_s3, %s659_s10  }
 0x505   :  { %652 = dma.done.wait [#allocation4], 256  }
 0x506   :  { %653 = vsyncadd [#allocation4], 4294967040 }
 0x507   :  { %448 = vsyncpa [#allocation3], 1 }
 0x508   :  { %449 = vsyncpa [#allocation6], 1 }
 0x509   :  { %450 = vsyncpa [#allocation9], 1 }
 0x50a   :  { %451 = vsyncpa [#allocation4], 1 }

</bundles_post_ra>
